<compile_context>
chip_gen: v6e
topology: v6e:2x2x1
jax: 0.10.0
libtpu: 0.0.40
codegen_flags: <defaults>
</compile_context>

<pallas_src>
import functools

import jax
import jax.numpy as jnp
import numpy as np
from jax import lax
from jax.experimental import pallas as pl
from jax.experimental.pallas import tpu as pltpu


# Left/right lane padding of the depthwise scratch.  Multiple of 128 keeps the
# interior store 128-lane aligned; >= W+1 so every tap window stays in bounds.
_LANE_PAD = 128


def _block_kernel(x_ref, w1_ref, s1_ref, b1_ref, w2_ref, s2_ref, b2_ref,
                  w3_ref, s3_ref, b3_ref, *rest,
                  H, W, Cin, P, Cout, stride, sc_mode):
    """One batch sample per grid step, channels-major (C, H*W) layout."""
    if sc_mode == "conv":
        ws_ref, ss_ref, bs_ref, o_ref, scr_ref = rest
    else:
        o_ref, scr_ref = rest

    M = H * W
    Ho = (H - 1) // stride + 1
    Wo = (W - 1) // stride + 1
    Mo = Ho * Wo
    pad = _LANE_PAD

    x = x_ref[0]                                            # (Cin, M) bf16

    # ---- conv1 (1x1) + bn1 + relu6: (P, Cin) @ (Cin, M) on the MXU --------
    t1 = jnp.dot(w1_ref[...], x, preferred_element_type=jnp.float32)
    t1 = jnp.clip(t1 * s1_ref[...] + b1_ref[...], 0.0, 6.0)  # (P, M) f32

    # ---- depthwise 3x3 (padding=1) + bn2 + relu6 ---------------------------
    # Stage t1 once into a lane-padded scratch: a tap at (dy, dx) is the
    # static lane window offset by dy*W + dx.  Row (dy) out-of-range taps read
    # the zeroed pad; column (dx) edge wrap-around is killed by two iota
    # masks.  Single f32 accumulator - no per-ky partial store/reload.
    scr_ref[:, 0:pad] = jnp.zeros((P, pad), jnp.float32)
    scr_ref[:, pad:pad + M] = t1                    # 128-aligned, unmasked vst
    scr_ref[:, pad + M:pad + M + pad] = jnp.zeros((P, pad), jnp.float32)

    col = lax.broadcasted_iota(jnp.int32, (1, M), 1) % W
    ok_left = col > 0                                # sampling (w-1) is valid
    ok_right = col < (W - 1)                         # sampling (w+1) is valid

    acc = jnp.zeros((P, M), jnp.float32)
    for ky in range(3):
        dy = ky - 1
        for kx in range(3):
            dx = kx - 1
            d = dy * W + dx
            window = scr_ref[:, pad + d:pad + d + M]        # (P, M) f32
            term = window * w2_ref[ky * 3 + kx]             # (P, 1) tap bcast
            if dx == -1:
                term = jnp.where(ok_left, term, 0.0)
            elif dx == 1:
                term = jnp.where(ok_right, term, 0.0)
            acc = acc + term

    if stride != 1:
        # Reduce to output resolution with a 0/1 selection matrix on the
        # otherwise idle MXU (no lane gather / strided subsample needed).
        out_pos = lax.broadcasted_iota(jnp.int32, (1, Mo), 1)
        src = (out_pos // Wo) * (W * stride) + (out_pos % Wo) * stride
        in_pos = lax.broadcasted_iota(jnp.int32, (M, 1), 0)
        sel = (in_pos == src).astype(jnp.float32)           # (M, Mo)
        acc = jnp.dot(acc, sel, preferred_element_type=jnp.float32)

    dw = jnp.clip(acc * s2_ref[...] + b2_ref[...], 0.0, 6.0)  # (P, Mo)

    # ---- conv3 (1x1) + bn3: (Cout, P) @ (P, Mo) on the MXU -----------------
    t3 = jnp.dot(w3_ref[...], dw.astype(jnp.bfloat16),
                 preferred_element_type=jnp.float32)
    t3 = t3 * s3_ref[...] + b3_ref[...]                     # (Cout, Mo)

    # ---- shortcut (stride == 1 only) --------------------------------------
    if sc_mode == "conv":
        sc = jnp.dot(ws_ref[...], x, preferred_element_type=jnp.float32)
        t3 = t3 + (sc * ss_ref[...] + bs_ref[...])
    elif sc_mode == "identity":
        t3 = t3 + x.astype(jnp.float32)

    # Lane-dense store: last dim is Ho*Wo (full 128-lane vst for stride 1).
    o_ref[0] = t3


def _padded_vmem_bytes(shape, dtype):
    """VMEM footprint of one buffer after (8, 128) tile padding."""
    s = list(shape)
    s[-1] = -(-s[-1] // 128) * 128
    if len(s) >= 2:
        s[-2] = -(-s[-2] // 8) * 8
    return int(np.prod(s)) * np.dtype(dtype).itemsize


def mobilenet_block(x_nchw, params, *, stride):
    N, Cin, H, W = x_nchw.shape
    P = params["w1"].shape[1]
    Cout = params["w3"].shape[1]
    Ho = (H - 1) // stride + 1
    Wo = (W - 1) // stride + 1
    M = H * W
    Mo = Ho * Wo
    if stride == 1:
        sc_mode = "conv" if Cin != Cout else "identity"
    else:
        sc_mode = "none"

    # NCHW flattens to the channels-major (C, H*W) kernel layout for free
    # (pure metadata reshape) - no NHWC transpose on either side.
    x = x_nchw.reshape(N, Cin, M).astype(jnp.bfloat16)

    def cvec(a):                                    # per-channel (C, 1) f32
        return a.reshape(-1, 1).astype(jnp.float32)

    weight_args = [
        params["w1"].T.astype(jnp.bfloat16),        # (P, Cin)
        cvec(params["s1"]), cvec(params["b1"]),
        params["w2"].reshape(9, P, 1).astype(jnp.float32),
        cvec(params["s2"]), cvec(params["b2"]),
        params["w3"].T.astype(jnp.bfloat16),        # (Cout, P)
        cvec(params["s3"]), cvec(params["b3"]),
    ]
    if sc_mode == "conv":
        # Shortcut operands only shipped when the block has a conv shortcut.
        weight_args += [params["ws"].T.astype(jnp.bfloat16),
                        cvec(params["ss"]), cvec(params["bs"])]

    kernel = functools.partial(_block_kernel, H=H, W=W, Cin=Cin, P=P,
                               Cout=Cout, stride=stride, sc_mode=sc_mode)

    def resident_spec(shape):
        nd = len(shape)
        return pl.BlockSpec(shape, lambda n, _z=(0,) * nd: _z)

    in_specs = [pl.BlockSpec((1, Cin, M), lambda n: (n, 0, 0))]
    in_specs += [resident_spec(tuple(a.shape)) for a in weight_args]
    out_spec = pl.BlockSpec((1, Cout, Mo), lambda n: (n, 0, 0))

    scratch_shape = (P, _LANE_PAD + M + _LANE_PAD)

    # Derive the VMEM budget from the actual (padded) block/scratch sizes
    # (double-buffered blocks) plus headroom, instead of a hard-coded limit.
    vmem_est = (2 * _padded_vmem_bytes((1, Cin, M), jnp.bfloat16)
                + 2 * _padded_vmem_bytes((1, Cout, Mo), jnp.float32)
                + sum(2 * _padded_vmem_bytes(a.shape, a.dtype)
                      for a in weight_args)
                + _padded_vmem_bytes(scratch_shape, jnp.float32))
    vmem_limit = int(min(100 << 20, max(vmem_est + (2 << 20), 16 << 20)))

    out = pl.pallas_call(
        kernel,
        out_shape=jax.ShapeDtypeStruct((N, Cout, Mo), jnp.float32),
        grid_spec=pltpu.PrefetchScalarGridSpec(
            num_scalar_prefetch=0,
            grid=(N,),                    # one sample per step; "parallel"
            in_specs=in_specs,            # -> megacore shards over the batch
            out_specs=out_spec,
            scratch_shapes=[pltpu.VMEM(scratch_shape, jnp.float32)],
        ),
        compiler_params=pltpu.CompilerParams(
            dimension_semantics=("parallel",),
            vmem_limit_bytes=vmem_limit),
    )(x, *weight_args)

    return out.reshape(N, Cout, Ho, Wo)             # NCHW, no transpose


def init_params(key, in_planes, out_planes, expansion):
    planes = expansion * in_planes
    ks = jax.random.split(key, 8)

    def bn_fold(k, c):
        kg, kb, km, kv = jax.random.split(k, 4)
        gamma = jax.random.uniform(kg, (c,), minval=0.5, maxval=1.5)
        beta = 0.1 * jax.random.normal(kb, (c,))
        mean = 0.1 * jax.random.normal(km, (c,))
        var = jax.random.uniform(kv, (c,), minval=0.5, maxval=1.5)
        scale = gamma / jnp.sqrt(var + 1e-5)
        bias = beta - mean * scale
        return (scale.reshape(1, c).astype(jnp.float32),
                bias.reshape(1, c).astype(jnp.float32))

    w1 = 0.2 * jax.random.normal(ks[0], (in_planes, planes), dtype=jnp.float32)
    w2 = 0.2 * jax.random.normal(ks[1], (3, 3, planes), dtype=jnp.float32)
    w3 = 0.2 * jax.random.normal(ks[2], (planes, out_planes), dtype=jnp.float32)
    ws = 0.2 * jax.random.normal(ks[3], (in_planes, out_planes),
                                 dtype=jnp.float32)
    s1, b1 = bn_fold(ks[4], planes)
    s2, b2 = bn_fold(ks[5], planes)
    s3, b3 = bn_fold(ks[6], out_planes)
    ss, bs = bn_fold(ks[7], out_planes)
    return dict(w1=w1, s1=s1, b1=b1, w2=w2, s2=s2, b2=b2,
                w3=w3, s3=s3, b3=b3, ws=ws, ss=ss, bs=bs)


def reference_block(x_nchw, params, *, stride, in_planes, out_planes):
    """Pure-JAX reference.  Mirrors the kernel's bf16 rounding of the MXU
    operands (values are identical pre-matmul; only accumulation order may
    differ)."""
    x = jnp.transpose(x_nchw, (0, 2, 3, 1)).astype(jnp.float32)
    dn = ('NHWC', 'HWIO', 'NHWC')
    P = params["w1"].shape[1]

    def q(a):
        return a.astype(jnp.bfloat16).astype(jnp.float32)

    def bn(y, s, b):
        return y * s.reshape(1, 1, 1, -1) + b.reshape(1, 1, 1, -1)

    t = lax.conv_general_dilated(q(x),
                                 q(params["w1"]).reshape(1, 1, in_planes, P),
                                 (1, 1), 'VALID', dimension_numbers=dn)
    t = jnp.clip(bn(t, params["s1"], params["b1"]), 0.0, 6.0)
    t = lax.conv_general_dilated(t, params["w2"].reshape(3, 3, 1, P),
                                 (stride, stride), ((1, 1), (1, 1)),
                                 dimension_numbers=dn, feature_group_count=P)
    t = jnp.clip(bn(t, params["s2"], params["b2"]), 0.0, 6.0)
    t = lax.conv_general_dilated(q(t),
                                 q(params["w3"]).reshape(1, 1, P, out_planes),
                                 (1, 1), 'VALID', dimension_numbers=dn)
    t = bn(t, params["s3"], params["b3"])
    if stride == 1:
        if in_planes != out_planes:
            sc = lax.conv_general_dilated(
                q(x), q(params["ws"]).reshape(1, 1, in_planes, out_planes),
                (1, 1), 'VALID', dimension_numbers=dn)
            sc = bn(sc, params["ss"], params["bs"])
        else:
            sc = q(x)
        t = t + sc
    return jnp.transpose(t, (0, 3, 1, 2))


if __name__ == "__main__":
    # Block(in_planes=4, out_planes=8, expansion=6, stride=1) - exercises the
    # conv+BN shortcut path.  Input NCHW: (2, 4, 16, 16).
    in_planes, out_planes, expansion, stride = 4, 8, 6, 1
    N, H, W = 2, 16, 16

    key = jax.random.PRNGKey(0)
    kx, kp = jax.random.split(key)
    x = jax.random.normal(kx, (N, in_planes, H, W), dtype=jnp.float32)
    params = init_params(kp, in_planes, out_planes, expansion)

    out = mobilenet_block(x, params, stride=stride)
    out = jax.block_until_ready(out)

    ref = reference_block(x, params, stride=stride,
                          in_planes=in_planes, out_planes=out_planes)
    ref = jax.block_until_ready(ref)

    assert out.shape == (N, out_planes, H // stride, W // stride)
    # Tolerance covers bf16 rounding of the MXU operands (the 1x1 convs run in
    # bf16 with f32 accumulation); genuine indexing/BN/shift bugs would be
    # orders of magnitude larger.
    np.testing.assert_allclose(np.asarray(out), np.asarray(ref),
                               rtol=5e-2, atol=5e-2)
    print("KERNEL_OK")
</pallas_src>

<mosaic_0001>
module attributes {stable_mosaic.version = 11 : i64} {
  func.func @_block_kernel(%arg0: i32, %arg1: memref<1x4x256xbf16, #tpu.memory_space<vmem>>, %arg2: memref<24x4xbf16, #tpu.memory_space<vmem>>, %arg3: memref<24x1xf32, #tpu.memory_space<vmem>>, %arg4: memref<24x1xf32, #tpu.memory_space<vmem>>, %arg5: memref<9x24x1xf32, #tpu.memory_space<vmem>>, %arg6: memref<24x1xf32, #tpu.memory_space<vmem>>, %arg7: memref<24x1xf32, #tpu.memory_space<vmem>>, %arg8: memref<8x24xbf16, #tpu.memory_space<vmem>>, %arg9: memref<8x1xf32, #tpu.memory_space<vmem>>, %arg10: memref<8x1xf32, #tpu.memory_space<vmem>>, %arg11: memref<8x4xbf16, #tpu.memory_space<vmem>>, %arg12: memref<8x1xf32, #tpu.memory_space<vmem>>, %arg13: memref<8x1xf32, #tpu.memory_space<vmem>>, %arg14: memref<1x8x256xf32, #tpu.memory_space<vmem>>, %arg15: memref<24x512xf32, #tpu.memory_space<vmem>>) attributes {dimension_semantics = [#tpu.dimension_semantics<parallel>], iteration_bounds = array<i64: 2>, scalar_prefetch = 0 : i64, scratch_operands = 1 : i64, tpu.core_type = #tpu.core_type<tc>, window_params = [{transform_indices = @transform_0, window_bounds = array<i64: 1, 4, 256>}, {pipeline_mode = #tpu.pipeline_mode<synchronous>, transform_indices = @transform_1, window_bounds = array<i64: 24, 4>}, {pipeline_mode = #tpu.pipeline_mode<synchronous>, transform_indices = @transform_2, window_bounds = array<i64: 24, 1>}, {pipeline_mode = #tpu.pipeline_mode<synchronous>, transform_indices = @transform_3, window_bounds = array<i64: 24, 1>}, {pipeline_mode = #tpu.pipeline_mode<synchronous>, transform_indices = @transform_4, window_bounds = array<i64: 9, 24, 1>}, {pipeline_mode = #tpu.pipeline_mode<synchronous>, transform_indices = @transform_5, window_bounds = array<i64: 24, 1>}, {pipeline_mode = #tpu.pipeline_mode<synchronous>, transform_indices = @transform_6, window_bounds = array<i64: 24, 1>}, {pipeline_mode = #tpu.pipeline_mode<synchronous>, transform_indices = @transform_7, window_bounds = array<i64: 8, 24>}, {pipeline_mode = #tpu.pipeline_mode<synchronous>, transform_indices = @transform_8, window_bounds = array<i64: 8, 1>}, {pipeline_mode = #tpu.pipeline_mode<synchronous>, transform_indices = @transform_9, window_bounds = array<i64: 8, 1>}, {pipeline_mode = #tpu.pipeline_mode<synchronous>, transform_indices = @transform_10, window_bounds = array<i64: 8, 4>}, {pipeline_mode = #tpu.pipeline_mode<synchronous>, transform_indices = @transform_11, window_bounds = array<i64: 8, 1>}, {pipeline_mode = #tpu.pipeline_mode<synchronous>, transform_indices = @transform_12, window_bounds = array<i64: 8, 1>}, {transform_indices = @transform_13, window_bounds = array<i64: 1, 8, 256>}]} {
    %c0 = arith.constant 0 : index
    %c0_0 = arith.constant 0 : index
    %c0_1 = arith.constant 0 : index
    %0 = vector.load %arg1[%c0, %c0_0, %c0_1] : memref<1x4x256xbf16, #tpu.memory_space<vmem>>, vector<1x4x256xbf16>
    %1 = vector.shape_cast %0 : vector<1x4x256xbf16> to vector<4x256xbf16>
    %c0_2 = arith.constant 0 : index
    %c0_3 = arith.constant 0 : index
    %2 = vector.load %arg2[%c0_2, %c0_3] : memref<24x4xbf16, #tpu.memory_space<vmem>>, vector<24x4xbf16>
    %cst = arith.constant dense<0.000000e+00> : vector<24x256xf32>
    %3 = tpu.matmul %2, %1, %cst {dimension_numbers = #tpu.dot_dimension_numbers<[1], [0], [0], [1], [0, 0, 1, 1], [], []>} : vector<24x4xbf16>, vector<4x256xbf16>, vector<24x256xf32> -> vector<24x256xf32>
    %c0_4 = arith.constant 0 : index
    %c0_5 = arith.constant 0 : index
    %4 = vector.load %arg3[%c0_4, %c0_5] : memref<24x1xf32, #tpu.memory_space<vmem>>, vector<24x1xf32>
    %5 = vector.broadcast %4 : vector<24x1xf32> to vector<24x256xf32>
    %6 = arith.mulf %3, %5 : vector<24x256xf32>
    %c0_6 = arith.constant 0 : index
    %c0_7 = arith.constant 0 : index
    %7 = vector.load %arg4[%c0_6, %c0_7] : memref<24x1xf32, #tpu.memory_space<vmem>>, vector<24x1xf32>
    %8 = vector.broadcast %7 : vector<24x1xf32> to vector<24x256xf32>
    %9 = arith.addf %6, %8 : vector<24x256xf32>
    %cst_8 = arith.constant 0.000000e+00 : f32
    %cst_9 = arith.constant 6.000000e+00 : f32
    %10 = vector.broadcast %cst_8 : f32 to vector<24x256xf32>
    %11 = arith.maximumf %10, %9 : vector<24x256xf32>
    %12 = vector.broadcast %cst_9 : f32 to vector<24x256xf32>
    %13 = arith.minimumf %12, %11 : vector<24x256xf32>
    %cst_10 = arith.constant 0.000000e+00 : f32
    %14 = vector.broadcast %cst_10 : f32 to vector<24x128xf32>
    %c0_11 = arith.constant 0 : index
    %c0_12 = arith.constant 0 : index
    %15 = vector.load %arg15[%c0_11, %c0_12] : memref<24x512xf32, #tpu.memory_space<vmem>>, vector<24x128xf32>
    tpu.vector_store %arg15[%c0_11, %c0_12], %14 {strides = array<i32>} : memref<24x512xf32, #tpu.memory_space<vmem>>, vector<24x128xf32>,
    %c0_13 = arith.constant 0 : index
    %c128 = arith.constant 128 : index
    %16 = vector.load %arg15[%c0_13, %c128] : memref<24x512xf32, #tpu.memory_space<vmem>>, vector<24x256xf32>
    tpu.vector_store %arg15[%c0_13, %c128], %13 {strides = array<i32>} : memref<24x512xf32, #tpu.memory_space<vmem>>, vector<24x256xf32>,
    %cst_14 = arith.constant 0.000000e+00 : f32
    %17 = vector.broadcast %cst_14 : f32 to vector<24x128xf32>
    %c0_15 = arith.constant 0 : index
    %c384 = arith.constant 384 : index
    %18 = vector.load %arg15[%c0_15, %c384] : memref<24x512xf32, #tpu.memory_space<vmem>>, vector<24x128xf32>
    tpu.vector_store %arg15[%c0_15, %c384], %17 {strides = array<i32>} : memref<24x512xf32, #tpu.memory_space<vmem>>, vector<24x128xf32>,
    %19 = tpu.iota {dimensions = array<i32: 1>} : vector<1x256xi32>
    %c16_i32 = arith.constant 16 : i32
    %c0_i32 = arith.constant 0 : i32
    %20 = arith.cmpi eq, %c16_i32, %c0_i32 : i32
    %c1_i32 = arith.constant 1 : i32
    %21 = arith.select %20, %c1_i32, %c16_i32 : i32
    %22 = vector.broadcast %21 : i32 to vector<1x256xi32>
    %23 = arith.remsi %19, %22 : vector<1x256xi32>
    %c0_i32_16 = arith.constant 0 : i32
    %24 = vector.broadcast %c0_i32_16 : i32 to vector<1x256xi32>
    %25 = arith.cmpi ne, %23, %24 : vector<1x256xi32>
    %c0_i32_17 = arith.constant 0 : i32
    %26 = vector.broadcast %c0_i32_17 : i32 to vector<1x256xi32>
    %27 = arith.cmpi slt, %23, %26 : vector<1x256xi32>
    %c0_i32_18 = arith.constant 0 : i32
    %28 = arith.cmpi slt, %21, %c0_i32_18 : i32
    %29 = vector.broadcast %28 : i1 to vector<1x256xi1>
    %30 = vector.broadcast %29 : vector<1x256xi1> to vector<1x256xi1>
    %31 = arith.xori %27, %30 : vector<1x256xi1>
    %32 = arith.andi %31, %25 : vector<1x256xi1>
    %33 = vector.broadcast %21 : i32 to vector<1x256xi32>
    %34 = arith.addi %23, %33 : vector<1x256xi32>
    %35 = arith.select %32, %34, %23 : vector<1x256xi1>, vector<1x256xi32>
    %c0_i32_19 = arith.constant 0 : i32
    %36 = vector.broadcast %c0_i32_19 : i32 to vector<1x256xi32>
    %37 = arith.cmpi sgt, %35, %36 : vector<1x256xi32>
    %c15_i32 = arith.constant 15 : i32
    %38 = vector.broadcast %c15_i32 : i32 to vector<1x256xi32>
    %39 = arith.cmpi slt, %35, %38 : vector<1x256xi32>
    %cst_20 = arith.constant 0.000000e+00 : f32
    %40 = vector.broadcast %cst_20 : f32 to vector<24x256xf32>
    %c0_21 = arith.constant 0 : index
    %c111 = arith.constant 111 : index
    %41 = vector.load %arg15[%c0_21, %c111] : memref<24x512xf32, #tpu.memory_space<vmem>>, vector<24x256xf32>
    %c0_22 = arith.constant 0 : index
    %c0_23 = arith.constant 0 : index
    %c0_24 = arith.constant 0 : index
    %42 = vector.load %arg5[%c0_22, %c0_23, %c0_24] : memref<9x24x1xf32, #tpu.memory_space<vmem>>, vector<1x24x1xf32>
    %43 = vector.shape_cast %42 : vector<1x24x1xf32> to vector<24x1xf32>
    %44 = vector.broadcast %43 : vector<24x1xf32> to vector<24x256xf32>
    %45 = arith.mulf %41, %44 : vector<24x256xf32>
    %cst_25 = arith.constant 0.000000e+00 : f32
    %46 = vector.shape_cast %37 : vector<1x256xi1> to vector<1x256xi1>
    %47 = vector.broadcast %46 : vector<1x256xi1> to vector<24x256xi1>
    %48 = vector.broadcast %cst_25 : f32 to vector<24x256xf32>
    %49 = arith.select %47, %45, %48 : vector<24x256xi1>, vector<24x256xf32>
    %50 = arith.addf %40, %49 : vector<24x256xf32>
    %c0_26 = arith.constant 0 : index
    %c112 = arith.constant 112 : index
    %51 = vector.load %arg15[%c0_26, %c112] : memref<24x512xf32, #tpu.memory_space<vmem>>, vector<24x256xf32>
    %c1 = arith.constant 1 : index
    %c0_27 = arith.constant 0 : index
    %c0_28 = arith.constant 0 : index
    %52 = vector.load %arg5[%c1, %c0_27, %c0_28] : memref<9x24x1xf32, #tpu.memory_space<vmem>>, vector<1x24x1xf32>
    %53 = vector.shape_cast %52 : vector<1x24x1xf32> to vector<24x1xf32>
    %54 = vector.broadcast %53 : vector<24x1xf32> to vector<24x256xf32>
    %55 = arith.mulf %51, %54 : vector<24x256xf32>
    %56 = arith.addf %50, %55 : vector<24x256xf32>
    %c0_29 = arith.constant 0 : index
    %c113 = arith.constant 113 : index
    %57 = vector.load %arg15[%c0_29, %c113] : memref<24x512xf32, #tpu.memory_space<vmem>>, vector<24x256xf32>
    %c2 = arith.constant 2 : index
    %c0_30 = arith.constant 0 : index
    %c0_31 = arith.constant 0 : index
    %58 = vector.load %arg5[%c2, %c0_30, %c0_31] : memref<9x24x1xf32, #tpu.memory_space<vmem>>, vector<1x24x1xf32>
    %59 = vector.shape_cast %58 : vector<1x24x1xf32> to vector<24x1xf32>
    %60 = vector.broadcast %59 : vector<24x1xf32> to vector<24x256xf32>
    %61 = arith.mulf %57, %60 : vector<24x256xf32>
    %cst_32 = arith.constant 0.000000e+00 : f32
    %62 = vector.shape_cast %39 : vector<1x256xi1> to vector<1x256xi1>
    %63 = vector.broadcast %62 : vector<1x256xi1> to vector<24x256xi1>
    %64 = vector.broadcast %cst_32 : f32 to vector<24x256xf32>
    %65 = arith.select %63, %61, %64 : vector<24x256xi1>, vector<24x256xf32>
    %66 = arith.addf %56, %65 : vector<24x256xf32>
    %c0_33 = arith.constant 0 : index
    %c127 = arith.constant 127 : index
    %67 = vector.load %arg15[%c0_33, %c127] : memref<24x512xf32, #tpu.memory_space<vmem>>, vector<24x256xf32>
    %c3 = arith.constant 3 : index
    %c0_34 = arith.constant 0 : index
    %c0_35 = arith.constant 0 : index
    %68 = vector.load %arg5[%c3, %c0_34, %c0_35] : memref<9x24x1xf32, #tpu.memory_space<vmem>>, vector<1x24x1xf32>
    %69 = vector.shape_cast %68 : vector<1x24x1xf32> to vector<24x1xf32>
    %70 = vector.broadcast %69 : vector<24x1xf32> to vector<24x256xf32>
    %71 = arith.mulf %67, %70 : vector<24x256xf32>
    %cst_36 = arith.constant 0.000000e+00 : f32
    %72 = vector.shape_cast %37 : vector<1x256xi1> to vector<1x256xi1>
    %73 = vector.broadcast %72 : vector<1x256xi1> to vector<24x256xi1>
    %74 = vector.broadcast %cst_36 : f32 to vector<24x256xf32>
    %75 = arith.select %73, %71, %74 : vector<24x256xi1>, vector<24x256xf32>
    %76 = arith.addf %66, %75 : vector<24x256xf32>
    %c0_37 = arith.constant 0 : index
    %c128_38 = arith.constant 128 : index
    %77 = vector.load %arg15[%c0_37, %c128_38] : memref<24x512xf32, #tpu.memory_space<vmem>>, vector<24x256xf32>
    %c4 = arith.constant 4 : index
    %c0_39 = arith.constant 0 : index
    %c0_40 = arith.constant 0 : index
    %78 = vector.load %arg5[%c4, %c0_39, %c0_40] : memref<9x24x1xf32, #tpu.memory_space<vmem>>, vector<1x24x1xf32>
    %79 = vector.shape_cast %78 : vector<1x24x1xf32> to vector<24x1xf32>
    %80 = vector.broadcast %79 : vector<24x1xf32> to vector<24x256xf32>
    %81 = arith.mulf %77, %80 : vector<24x256xf32>
    %82 = arith.addf %76, %81 : vector<24x256xf32>
    %c0_41 = arith.constant 0 : index
    %c129 = arith.constant 129 : index
    %83 = vector.load %arg15[%c0_41, %c129] : memref<24x512xf32, #tpu.memory_space<vmem>>, vector<24x256xf32>
    %c5 = arith.constant 5 : index
    %c0_42 = arith.constant 0 : index
    %c0_43 = arith.constant 0 : index
    %84 = vector.load %arg5[%c5, %c0_42, %c0_43] : memref<9x24x1xf32, #tpu.memory_space<vmem>>, vector<1x24x1xf32>
    %85 = vector.shape_cast %84 : vector<1x24x1xf32> to vector<24x1xf32>
    %86 = vector.broadcast %85 : vector<24x1xf32> to vector<24x256xf32>
    %87 = arith.mulf %83, %86 : vector<24x256xf32>
    %cst_44 = arith.constant 0.000000e+00 : f32
    %88 = vector.shape_cast %39 : vector<1x256xi1> to vector<1x256xi1>
    %89 = vector.broadcast %88 : vector<1x256xi1> to vector<24x256xi1>
    %90 = vector.broadcast %cst_44 : f32 to vector<24x256xf32>
    %91 = arith.select %89, %87, %90 : vector<24x256xi1>, vector<24x256xf32>
    %92 = arith.addf %82, %91 : vector<24x256xf32>
    %c0_45 = arith.constant 0 : index
    %c143 = arith.constant 143 : index
    %93 = vector.load %arg15[%c0_45, %c143] : memref<24x512xf32, #tpu.memory_space<vmem>>, vector<24x256xf32>
    %c6 = arith.constant 6 : index
    %c0_46 = arith.constant 0 : index
    %c0_47 = arith.constant 0 : index
    %94 = vector.load %arg5[%c6, %c0_46, %c0_47] : memref<9x24x1xf32, #tpu.memory_space<vmem>>, vector<1x24x1xf32>
    %95 = vector.shape_cast %94 : vector<1x24x1xf32> to vector<24x1xf32>
    %96 = vector.broadcast %95 : vector<24x1xf32> to vector<24x256xf32>
    %97 = arith.mulf %93, %96 : vector<24x256xf32>
    %cst_48 = arith.constant 0.000000e+00 : f32
    %98 = vector.shape_cast %37 : vector<1x256xi1> to vector<1x256xi1>
    %99 = vector.broadcast %98 : vector<1x256xi1> to vector<24x256xi1>
    %100 = vector.broadcast %cst_48 : f32 to vector<24x256xf32>
    %101 = arith.select %99, %97, %100 : vector<24x256xi1>, vector<24x256xf32>
    %102 = arith.addf %92, %101 : vector<24x256xf32>
    %c0_49 = arith.constant 0 : index
    %c144 = arith.constant 144 : index
    %103 = vector.load %arg15[%c0_49, %c144] : memref<24x512xf32, #tpu.memory_space<vmem>>, vector<24x256xf32>
    %c7 = arith.constant 7 : index
    %c0_50 = arith.constant 0 : index
    %c0_51 = arith.constant 0 : index
    %104 = vector.load %arg5[%c7, %c0_50, %c0_51] : memref<9x24x1xf32, #tpu.memory_space<vmem>>, vector<1x24x1xf32>
    %105 = vector.shape_cast %104 : vector<1x24x1xf32> to vector<24x1xf32>
    %106 = vector.broadcast %105 : vector<24x1xf32> to vector<24x256xf32>
    %107 = arith.mulf %103, %106 : vector<24x256xf32>
    %108 = arith.addf %102, %107 : vector<24x256xf32>
    %c0_52 = arith.constant 0 : index
    %c145 = arith.constant 145 : index
    %109 = vector.load %arg15[%c0_52, %c145] : memref<24x512xf32, #tpu.memory_space<vmem>>, vector<24x256xf32>
    %c8 = arith.constant 8 : index
    %c0_53 = arith.constant 0 : index
    %c0_54 = arith.constant 0 : index
    %110 = vector.load %arg5[%c8, %c0_53, %c0_54] : memref<9x24x1xf32, #tpu.memory_space<vmem>>, vector<1x24x1xf32>
    %111 = vector.shape_cast %110 : vector<1x24x1xf32> to vector<24x1xf32>
    %112 = vector.broadcast %111 : vector<24x1xf32> to vector<24x256xf32>
    %113 = arith.mulf %109, %112 : vector<24x256xf32>
    %cst_55 = arith.constant 0.000000e+00 : f32
    %114 = vector.shape_cast %39 : vector<1x256xi1> to vector<1x256xi1>
    %115 = vector.broadcast %114 : vector<1x256xi1> to vector<24x256xi1>
    %116 = vector.broadcast %cst_55 : f32 to vector<24x256xf32>
    %117 = arith.select %115, %113, %116 : vector<24x256xi1>, vector<24x256xf32>
    %118 = arith.addf %108, %117 : vector<24x256xf32>
    %c0_56 = arith.constant 0 : index
    %c0_57 = arith.constant 0 : index
    %119 = vector.load %arg6[%c0_56, %c0_57] : memref<24x1xf32, #tpu.memory_space<vmem>>, vector<24x1xf32>
    %120 = vector.broadcast %119 : vector<24x1xf32> to vector<24x256xf32>
    %121 = arith.mulf %118, %120 : vector<24x256xf32>
    %c0_58 = arith.constant 0 : index
    %c0_59 = arith.constant 0 : index
    %122 = vector.load %arg7[%c0_58, %c0_59] : memref<24x1xf32, #tpu.memory_space<vmem>>, vector<24x1xf32>
    %123 = vector.broadcast %122 : vector<24x1xf32> to vector<24x256xf32>
    %124 = arith.addf %121, %123 : vector<24x256xf32>
    %cst_60 = arith.constant 0.000000e+00 : f32
    %cst_61 = arith.constant 6.000000e+00 : f32
    %125 = vector.broadcast %cst_60 : f32 to vector<24x256xf32>
    %126 = arith.maximumf %125, %124 : vector<24x256xf32>
    %127 = vector.broadcast %cst_61 : f32 to vector<24x256xf32>
    %128 = arith.minimumf %127, %126 : vector<24x256xf32>
    %c0_62 = arith.constant 0 : index
    %c0_63 = arith.constant 0 : index
    %129 = vector.load %arg8[%c0_62, %c0_63] : memref<8x24xbf16, #tpu.memory_space<vmem>>, vector<8x24xbf16>
    %130 = arith.truncf %128 : vector<24x256xf32> to vector<24x256xbf16>
    %cst_64 = arith.constant dense<0.000000e+00> : vector<8x256xf32>
    %131 = tpu.matmul %129, %130, %cst_64 {dimension_numbers = #tpu.dot_dimension_numbers<[1], [0], [0], [1], [0, 0, 1, 1], [], []>} : vector<8x24xbf16>, vector<24x256xbf16>, vector<8x256xf32> -> vector<8x256xf32>
    %c0_65 = arith.constant 0 : index
    %c0_66 = arith.constant 0 : index
    %132 = vector.load %arg9[%c0_65, %c0_66] : memref<8x1xf32, #tpu.memory_space<vmem>>, vector<8x1xf32>
    %133 = vector.broadcast %132 : vector<8x1xf32> to vector<8x256xf32>
    %134 = arith.mulf %131, %133 : vector<8x256xf32>
    %c0_67 = arith.constant 0 : index
    %c0_68 = arith.constant 0 : index
    %135 = vector.load %arg10[%c0_67, %c0_68] : memref<8x1xf32, #tpu.memory_space<vmem>>, vector<8x1xf32>
    %136 = vector.broadcast %135 : vector<8x1xf32> to vector<8x256xf32>
    %137 = arith.addf %134, %136 : vector<8x256xf32>
    %c0_69 = arith.constant 0 : index
    %c0_70 = arith.constant 0 : index
    %138 = vector.load %arg11[%c0_69, %c0_70] : memref<8x4xbf16, #tpu.memory_space<vmem>>, vector<8x4xbf16>
    %cst_71 = arith.constant dense<0.000000e+00> : vector<8x256xf32>
    %139 = tpu.matmul %138, %1, %cst_71 {dimension_numbers = #tpu.dot_dimension_numbers<[1], [0], [0], [1], [0, 0, 1, 1], [], []>} : vector<8x4xbf16>, vector<4x256xbf16>, vector<8x256xf32> -> vector<8x256xf32>
    %c0_72 = arith.constant 0 : index
    %c0_73 = arith.constant 0 : index
    %140 = vector.load %arg12[%c0_72, %c0_73] : memref<8x1xf32, #tpu.memory_space<vmem>>, vector<8x1xf32>
    %141 = vector.broadcast %140 : vector<8x1xf32> to vector<8x256xf32>
    %142 = arith.mulf %139, %141 : vector<8x256xf32>
    %c0_74 = arith.constant 0 : index
    %c0_75 = arith.constant 0 : index
    %143 = vector.load %arg13[%c0_74, %c0_75] : memref<8x1xf32, #tpu.memory_space<vmem>>, vector<8x1xf32>
    %144 = vector.broadcast %143 : vector<8x1xf32> to vector<8x256xf32>
    %145 = arith.addf %142, %144 : vector<8x256xf32>
    %146 = arith.addf %137, %145 : vector<8x256xf32>
    %c0_76 = arith.constant 0 : index
    %c0_77 = arith.constant 0 : index
    %c0_78 = arith.constant 0 : index
    %147 = vector.load %arg14[%c0_76, %c0_77, %c0_78] : memref<1x8x256xf32, #tpu.memory_space<vmem>>, vector<1x8x256xf32>
    %148 = vector.shape_cast %147 : vector<1x8x256xf32> to vector<8x256xf32>
    %149 = vector.shape_cast %146 : vector<8x256xf32> to vector<1x8x256xf32>
    tpu.vector_store %arg14[%c0_76, %c0_77, %c0_78], %149 {strides = array<i32>} : memref<1x8x256xf32, #tpu.memory_space<vmem>>, vector<1x8x256xf32>,
    return
  }
  func.func @transform_0(%arg0: i32) -> (i32, i32, i32) {
    %c0_i32 = arith.constant 0 : i32
    %c0_i32_0 = arith.constant 0 : i32
    %c0_i32_1 = arith.constant 0 : i32
    return %arg0, %c0_i32, %c0_i32_0 : i32, i32, i32
  }
  func.func @transform_1(%arg0: i32) -> (i32, i32) {
    %c0_i32 = arith.constant 0 : i32
    %c0_i32_0 = arith.constant 0 : i32
    %c0_i32_1 = arith.constant 0 : i32
    return %c0_i32, %c0_i32_0 : i32, i32
  }
  func.func @transform_2(%arg0: i32) -> (i32, i32) {
    %c0_i32 = arith.constant 0 : i32
    %c0_i32_0 = arith.constant 0 : i32
    %c0_i32_1 = arith.constant 0 : i32
    return %c0_i32, %c0_i32_0 : i32, i32
  }
  func.func @transform_3(%arg0: i32) -> (i32, i32) {
    %c0_i32 = arith.constant 0 : i32
    %c0_i32_0 = arith.constant 0 : i32
    %c0_i32_1 = arith.constant 0 : i32
    return %c0_i32, %c0_i32_0 : i32, i32
  }
  func.func @transform_4(%arg0: i32) -> (i32, i32, i32) {
    %c0_i32 = arith.constant 0 : i32
    %c0_i32_0 = arith.constant 0 : i32
    %c0_i32_1 = arith.constant 0 : i32
    %c0_i32_2 = arith.constant 0 : i32
    return %c0_i32, %c0_i32_0, %c0_i32_1 : i32, i32, i32
  }
  func.func @transform_5(%arg0: i32) -> (i32, i32) {
    %c0_i32 = arith.constant 0 : i32
    %c0_i32_0 = arith.constant 0 : i32
    %c0_i32_1 = arith.constant 0 : i32
    return %c0_i32, %c0_i32_0 : i32, i32
  }
  func.func @transform_6(%arg0: i32) -> (i32, i32) {
    %c0_i32 = arith.constant 0 : i32
    %c0_i32_0 = arith.constant 0 : i32
    %c0_i32_1 = arith.constant 0 : i32
    return %c0_i32, %c0_i32_0 : i32, i32
  }
  func.func @transform_7(%arg0: i32) -> (i32, i32) {
    %c0_i32 = arith.constant 0 : i32
    %c0_i32_0 = arith.constant 0 : i32
    %c0_i32_1 = arith.constant 0 : i32
    return %c0_i32, %c0_i32_0 : i32, i32
  }
  func.func @transform_8(%arg0: i32) -> (i32, i32) {
    %c0_i32 = arith.constant 0 : i32
    %c0_i32_0 = arith.constant 0 : i32
    %c0_i32_1 = arith.constant 0 : i32
    return %c0_i32, %c0_i32_0 : i32, i32
  }
  func.func @transform_9(%arg0: i32) -> (i32, i32) {
    %c0_i32 = arith.constant 0 : i32
    %c0_i32_0 = arith.constant 0 : i32
    %c0_i32_1 = arith.constant 0 : i32
    return %c0_i32, %c0_i32_0 : i32, i32
  }
  func.func @transform_10(%arg0: i32) -> (i32, i32) {
    %c0_i32 = arith.constant 0 : i32
    %c0_i32_0 = arith.constant 0 : i32
    %c0_i32_1 = arith.constant 0 : i32
    return %c0_i32, %c0_i32_0 : i32, i32
  }
  func.func @transform_11(%arg0: i32) -> (i32, i32) {
    %c0_i32 = arith.constant 0 : i32
    %c0_i32_0 = arith.constant 0 : i32
    %c0_i32_1 = arith.constant 0 : i32
    return %c0_i32, %c0_i32_0 : i32, i32
  }
  func.func @transform_12(%arg0: i32) -> (i32, i32) {
    %c0_i32 = arith.constant 0 : i32
    %c0_i32_0 = arith.constant 0 : i32
    %c0_i32_1 = arith.constant 0 : i32
    return %c0_i32, %c0_i32_0 : i32, i32
  }
  func.func @transform_13(%arg0: i32) -> (i32, i32, i32) {
    %c0_i32 = arith.constant 0 : i32
    %c0_i32_0 = arith.constant 0 : i32
    %c0_i32_1 = arith.constant 0 : i32
    return %arg0, %c0_i32, %c0_i32_0 : i32, i32, i32
  }
}

</mosaic_0001>

<bundles_post_ra>
// kernel: tpu_custom_call.1
= control target key start
LH: loop header
LB: loop body
LE: loop exit
PB: predicated region body
PF: predicated region fallthrough
CT: control target
= control target key end

     0   :  { %s2602_s0 = inlined_call_operand.vmem [shape: bf16[2,4,256], index: 0, kind: input, shape index: {}]   ;;  %s2603_s1 = inlined_call_operand.vmem [shape: bf16[24,4], index: 1, kind: input, shape index: {}]   ;;  %s2604_s2 = inlined_call_operand.vmem [shape: f32[24,1], index: 2, kind: input, shape index: {}]   ;;  %s2605_s3 = inlined_call_operand.vmem [shape: f32[24,1], index: 3, kind: input, shape index: {}]   ;;  %s2606_s4 = inlined_call_operand.vmem [shape: f32[9,24,1], index: 4, kind: input, shape index: {}]   ;;  %s2607_s5 = inlined_call_operand.vmem [shape: f32[24,1], index: 5, kind: input, shape index: {}]   ;;  %s2608_s6 = inlined_call_operand.vmem [shape: f32[24,1], index: 6, kind: input, shape index: {}]   ;;  %s2609_s7 = inlined_call_operand.vmem [shape: bf16[8,24], index: 7, kind: input, shape index: {}]   ;;  %s2610_s8 = inlined_call_operand.vmem [shape: f32[8,1], index: 8, kind: input, shape index: {}]   ;;  %s2611_s9 = inlined_call_operand.vmem [shape: f32[8,1], index: 9, kind: input, shape index: {}]   ;;  %s2612_s10 = inlined_call_operand.vmem [shape: bf16[8,4], index: 10, kind: input, shape index: {}]   ;;  %s2613_s11 = inlined_call_operand.vmem [shape: f32[8,1], index: 11, kind: input, shape index: {}]   ;;  %s2614_s12 = inlined_call_operand.vmem [shape: f32[8,1], index: 12, kind: input, shape index: {}]   ;;  %s2615_s13 = inlined_call_operand.hbm [shape: f32[2,8,256], index: 13, kind: output, shape index: {}]  }
   0x1   :  { %2616 = sst [smem:[#allocation7_spill]] %s2602_s0 }
   0x2   :  { %2617 = sst [smem:[#allocation8_spill]] %s2603_s1 }
   0x3   :  { %2618 = sst [smem:[#allocation9_spill]] %s2604_s2 }
   0x4   :  { %18 = vsyncpa [#allocation4], 0 }
   0x5   :  { %20 = vsyncpa [#allocation4 + $0x1], 0  ;;  %s1827_s25 = smov 0   ;;  %s1829_s26 = smov 0  }
   0x6   :  { %s1831_s27 = smov 0   ;;  %s1833_s28 = smov 0  }
   0x7 LB: > { %s1848_s29 = sadd.s32 4294967295, %s1745_s28   ;;  %s1585_s30 = sadd.s32 4294967294, %s1745_s28   ;;  %s1745_s28 = sphi %s1833_s28, %s2637_s28   ;;  %s1741_s27 = sphi %s1831_s27, %s2636_s27   ;;  %s1737_s26 = sphi %s1829_s26, %s2635_s26   ;;  %s1733_s25 = sphi %s1827_s25, %s2634_s25  }
   0x8   : > { %s1852_s14 = sadd.s32 1, %s1745_s28   ;;  %s311_s15 = sadd.s32 1, %s1741_s27 }
   0x9   : > { %s308_s16 = ssub.s32 %s1745_s28, %s1852_s14  ;;  %p321_p0 = scmp.ne.s32.totalorder %s1741_s27, %s1737_s26 }
   0xa   : > { %p309_p1 = scmp.eq.s32.totalorder %s308_s16, 0  ;;  %p322_p2 = scmp.eq.s32.totalorder %s1848_s29, 1 }
   0xb   : > { %p327_p3 = scmp.ne.s32.totalorder %s1737_s26, %s1733_s25  ;;  %p328_p4 = scmp.eq.s32.totalorder %s1585_s30, 1 }
   0xc   : > { %s1863_s17 = scalar_select %p309_p1, %s1741_s27, %s311_s15  }
   0xd   : > { %p1865_p5 = por %p322_p2, %p321_p0  ;;  %p1869_p6 = por %p328_p4, %p327_p3 }
   0xe   : > { %2619 = sst [smem:[#allocation6_spill]] %s1863_s17  ;;  %p1588_p7 = scmp.ge.s32.totalorder %s1745_s28, 1 }
   0xf   : > { %p390_p8 = scmp.lt.s32.totalorder %s1745_s28, 3 }
  0x11   : > { %p391_p9 = pnand %p1588_p7, %p390_p8 }
  0x12   : > { %s2622_s2 = sld [smem:[#allocation9_spill]] (!%p391_p9)  ;;  %p434_p10 = scmp.lt.s32.totalorder (!%p391_p9), %s1848_s29, 1 }
  0x13   : > { %394 = sbr.rel (%p391_p9) target bundleno = 708 (0x2c4), region = 72  ;;  %s2623_s0 = sld [smem:[#allocation7_spill]] (!%p391_p9) }
  0x14   : > { %s2624_s1 = sld [smem:[#allocation8_spill]] (!%p391_p9)  ;;  %s1748_s15 = smov (!%p391_p9), 16  }
  0x15   : > { %s1749_s16 = smov (!%p391_p9), 17   ;;  %s1750_s20 = smov (!%p391_p9), 15  }
  0x16   : > { %s1755_s22 = smov (!%p391_p9), 111  }
  0x18   : > { %v526_v0 = vld [vmem:[%s2622_s2] sm:$0xff]  ;;  %v528_v1 = vld [vmem:[%s2622_s2 + $0x10] sm:$0xff]  ;;  %v1747_v2 = vmov 0   ;;  %s435_s24 = scalar_select %p434_p10, %s1848_s29, 1  ;;  %v527_v3 = vld [vmem:[%s2622_s2 + $0x8] sm:$0xff]  ;;  %vm468_vm0 = vcmask 1041408  }
  0x19   : > { %1682 = vset.pattern.permute.xlu1 %v1747_v2  ;;  %1681 = vset.pattern.permute.xlu0 %v1747_v2  ;;  %v552_v4 = vld [vmem:[%s2605_s3 + $0x10] sm:$0xff]  ;;  %v551_v7 = vld [vmem:[%s2605_s3 + $0x8] sm:$0xff]  ;;  %v550_v8 = vld [vmem:[%s2605_s3] sm:$0xff]  ;;  %vm461_vm1 = vcmask 31744   ;;  %vm776_vm2 = vcmask 130048   ;;  %vm696_vm3 = vcmask 138240  }
  0x1a   : > { %531 = vperm.xlu1 %1682, %v526_v0   ;;  %541 = vperm.xlu0 %1681, %v528_v1   ;;  %s1631_s21 = sshll.u32 %s435_s24, 2  ;;  %v1683_v10 = vld [vmem:[%s2624_s1] sm:$0xff]   ;;  %v1600_v11 = vld [vmem:[%s2606_s4 + $0x28] sm:$0xff]  ;;  %v640_v12 = vld [vmem:[%s2606_s4 + $0x10] sm:$0xff]  ;;  %s1751_s24 = smov 1   ;;  %vm854_vm5 = vcmask 121856  }
  0x1b   : > { %507 = vmatprep.mubr.bf16.mxu0 %v1747_v2  ;;  %1421 = vmatprep.mubr.bf16.mxu1 %v1747_v2  ;;  %s438_s17 = scalar_lea.vmem %s2623_s0, %s1631_s21  ;;  %v638_v13 = vld [vmem:[%s2606_s4] sm:$0xff]  ;;  %v1684_v15 = vld [vmem:[%s2624_s1 + $0x8] ss:$0 sps:$4 sm:$0xff]   ;;  %v1606_v16 = vld [vmem:[%s2606_s4 + $0x58] sm:$0xff]  ;;  %s1753_s21 = smov 113   ;;  %vm934_vm7 = vcmask 7168  }
  0x1c   : > { %v1594_v5 = vld.sshfl [vmem:[%s438_s17] sm:$0x33 pattern:$0x76325410]  ;;  %v639_v17 = vld [vmem:[%s2606_s4 + $0x8] sm:$0xff]  ;;  %v1598_v19 = vld [vmem:[%s2606_s4 + $0x18] sm:$0xff] }
  0x1d   : > { %v1896_v6 = vcombine.high %v1594_v5, %v1594_v5  ;;  %v1905_v9 = vsel %vm468_vm0, %v1594_v5, 0  ;;  %v1603_v14 = vld [vmem:[%s2606_s4 + $0x40] sm:$0xff]  ;;  %v1602_v20 = vld [vmem:[%s2606_s4 + $0x38] sm:$0xff]  ;;  %v1601_v21 = vld [vmem:[%s2606_s4 + $0x30] sm:$0xff]  ;;  %s1752_s17 = smov 127   ;;  %s1754_s0 = smov 112  }
  0x1e   : > { %536 = vperm.xlu1 %1682, %v527_v3   ;;  %565 = vperm.xlu0 %1681, %v552_v4   ;;  %v1599_v18 = vld [vmem:[%s2606_s4 + $0x20] sm:$0xff]  ;;  %v1605_v22 = vld [vmem:[%s2606_s4 + $0x50] sm:$0xff]  ;;  %v1604_v23 = vld [vmem:[%s2606_s4 + $0x48] sm:$0xff]  ;;  %vm1054_vm10 = vcmask 1039360   ;;  %vm1134_vm11 = vcmask 924672   ;;  %vm1214_vm12 = vcmask 916480  }
  0x1f   : > { %1595 = vmatprep.subr.msk.bf16.mxu0 %vm468_vm0, %v1896_v6  ;;  %v1615_v24 = vld [vmem:[%s2606_s4 + $0xa0] sm:$0xff]  ;;  %v1612_v25 = vld [vmem:[%s2606_s4 + $0x88] sm:$0xff]  ;;  %v1610_v27 = vld [vmem:[%s2606_s4 + $0x78] sm:$0xff]  ;;  %vm1288_vm13 = vcmask 908288   ;;  %vm1382_vm14 = vcmask 1043456   ;;  %vm1378_vm15 = vcmask 195584  }
  0x20   : > { %490 = vmatpush1.bf16.msra.mxu0 %v1905_v9  ;;  %v1611_v26 = vld [vmem:[%s2606_s4 + $0x80] sm:$0xff]  ;;  %v1613_v28 = vld [vmem:[%s2606_s4 + $0x90] sm:$0xff]  ;;  %v1618_v29 = vld [vmem:[%s2606_s4 + $0xb8] sm:$0xff] }
  0x21   : > { %v1621_v30 = vld [vmem:[%s2606_s4 + $0xd0] sm:$0xff]  ;;  %v1614_v31 = vld [vmem:[%s2606_s4 + $0x98] sm:$0xff]  ;;  %v1616_v33 = vld [vmem:[%s2606_s4 + $0xa8] sm:$0xff] }
  0x22   : > { %560 = vperm.xlu1 %1682, %v551_v7   ;;  %555 = vperm.xlu0 %1681, %v550_v8   ;;  %v1617_v32 = vld [vmem:[%s2606_s4 + $0xb0] sm:$0xff]  ;;  %v1620_v34 = vld [vmem:[%s2606_s4 + $0xc8] sm:$0xff]  ;;  %v1619_v35 = vld [vmem:[%s2606_s4 + $0xc0] sm:$0xff] }
  0x23   : > { %1596 = vmatmul.mubr.msk.bf16.vlgmr.msra.gmra.mxu0 %vm461_vm1, %v1683_v10  ;;  %v1607_v36 = vld [vmem:[%s2606_s4 + $0x60] sm:$0xff]  ;;  %v1609_v37 = vld [vmem:[%s2606_s4 + $0x70] sm:$0xff]  ;;  %v1608_v39 = vld [vmem:[%s2606_s4 + $0x68] sm:$0xff] }
  0x24   : > { %517 = vmatprep.mubr.bf16.mxu0 %v1747_v2  ;;  %v1313_v38 = vld [vmem:[%s2607_s5] sm:$0xff]  ;;  %v1315_v40 = vld [vmem:[%s2607_s5 + $0x10] sm:$0xff]  ;;  %v1314_v42 = vld [vmem:[%s2607_s5 + $0x8] sm:$0xff] }
  0x25   : > { %v1339_v41 = vld [vmem:[%s2608_s6 + $0x10] sm:$0xff] }
  0x26   : > { %737 = vperm.xlu1 %1682, %v1600_v11   ;;  %653 = vperm.xlu0 %1681, %v640_v12  }
  0x2a   : > { %643 = vperm.xlu1 %1682, %v638_v13   ;;  %811 = vperm.xlu0 %1681, %v1603_v14  }
  0x2b   : > { %1597 = vmatmul.mubr.msk.bf16.gmra.mxu0 %vm461_vm1, %v1684_v15 }
  0x2e   : > { %895 = vperm.xlu1 %1682, %v1606_v16   ;;  %648 = vperm.xlu0 %1681, %v639_v17  }
  0x32   : > { %732 = vperm.xlu1 %1682, %v1599_v18   ;;  %727 = vperm.xlu0 %1681, %v1598_v19  }
  0x36   : > { %806 = vperm.xlu1 %1682, %v1602_v20   ;;  %801 = vperm.xlu0 %1681, %v1601_v21  }
  0x3a   : > { %890 = vperm.xlu1 %1682, %v1605_v22   ;;  %885 = vperm.xlu0 %1681, %v1604_v23  }
  0x3e   : > { %1095 = vperm.xlu1 %1682, %v1615_v24   ;;  %1015 = vperm.xlu0 %1681, %v1612_v25  }
  0x42   : > { %1010 = vperm.xlu1 %1682, %v1611_v26   ;;  %1005 = vperm.xlu0 %1681, %v1610_v27  }
  0x46   : > { %1085 = vperm.xlu1 %1682, %v1613_v28   ;;  %1175 = vperm.xlu0 %1681, %v1618_v29  }
  0x4a   : > { %1249 = vperm.xlu1 %1682, %v1621_v30   ;;  %1090 = vperm.xlu0 %1681, %v1614_v31  }
  0x4e   : > { %1170 = vperm.xlu1 %1682, %v1617_v32   ;;  %1165 = vperm.xlu0 %1681, %v1616_v33  }
  0x52   : > { %1244 = vperm.xlu1 %1682, %v1620_v34   ;;  %1239 = vperm.xlu0 %1681, %v1619_v35  }
  0x56   : > { %965 = vperm.xlu1 %1682, %v1607_v36   ;;  %975 = vperm.xlu0 %1681, %v1609_v37  }
  0x5a   : > { %1318 = vperm.xlu1 %1682, %v1313_v38   ;;  %970 = vperm.xlu0 %1681, %v1608_v39  }
  0x5e   : > { %1328 = vperm.xlu0 %1681, %v1315_v40  }
  0x62   : > { %1352 = vperm.xlu0 %1681, %v1339_v41  }
  0x66   : > { %1323 = vperm.xlu0 %1681, %v1314_v42  }
  0x95   : > { %v2012_v43 = vpop.permute.xlu1 %531  ;;  %v2014_v44 = vpop.permute.xlu0 %541 }
  0x99   : > { %v2016_v45 = vpop.permute.xlu1 %536  ;;  %v2018_v46 = vpop.permute.xlu0 %565 }
  0x9d   : > { %v2020_v47 = vpop.permute.xlu1 %560  ;;  %v2022_v48 = vpop.permute.xlu0 %555 }
  0xa1   : > { %v2024_v49 = vpop.permute.xlu1 %737  ;;  %v2026_v50 = vpop.permute.xlu0 %653 }
  0xa2   : > { %v746_v51 = vmul.f32 0.0, %v2024_v49  ;;  %v662_v52 = vmul.f32 0.0, %v2026_v50 }
  0xa4   : > { %770 = vrot.lane.b32.xlu1 %v746_v51, %s1748_s15  ;;  %690 = vrot.lane.b32.xlu0 %v662_v52, %s1749_s16 }
  0xa5   : > { %v2031_v53 = vpop.permute.xlu1 %643  ;;  %v2034_v54 = vpop.permute.xlu0 %811 }
  0xa6   : > { %v820_v55 = vmul.f32 0.0, %v2034_v54  ;;  %v656_v57 = vmul.f32 0.0, %v2031_v53 }
  0xa8   : > { %848 = vrot.lane.b32.xlu1 %v820_v55, %s1750_s20 }
  0xa9   : > { %v2037_v56 = vpop.permute.xlu1 %895  ;;  %v2041_v58 = vpop.permute.xlu0 %648 }
  0xaa   : > { %v904_v59 = vmul.f32 0.0, %v2037_v56  ;;  %v659_v60 = vmul.f32 0.0, %v2041_v58 }
  0xac   : > { %928 = vrot.lane.b32.xlu0 %v904_v59, %s1751_s24  ;;  %678 = vrot.lane.b32.xlu1 %v656_v57, %s1749_s16 }
  0xad   : > { %v2046_v61 = vpop.permute.xlu1 %732  ;;  %v2049_v62 = vpop.permute.xlu0 %727 }
  0xae   : > { %v740_v63 = vmul.f32 0.0, %v2049_v62  ;;  %v743_v0 = vmul.f32 0.0, %v2046_v61 }
  0xb0   : > { %684 = vrot.lane.b32.xlu0 %v659_v60, %s1749_s16  ;;  %758 = vrot.lane.b32.xlu1 %v740_v63, %s1748_s15 }
  0xb1   : > { %v2054_v1 = vpop.permute.xlu1 %806  ;;  %v2057_v3 = vpop.permute.xlu0 %801 }
  0xb2   : > { %v814_v4 = vmul.f32 0.0, %v2057_v3  ;;  %v817_v5 = vmul.f32 0.0, %v2054_v1 }
  0xb4   : > { %764 = vrot.lane.b32.xlu0 %v743_v0, %s1748_s15  ;;  %836 = vrot.lane.b32.xlu1 %v814_v4, %s1750_s20 }
  0xb5   : > { %v2062_v7 = vpop.permute.xlu1 %890  ;;  %v2065_v8 = vpop.permute.xlu0 %885 }
  0xb6   : > { %v898_v10 = vmul.f32 0.0, %v2065_v8  ;;  %v901_v17 = vmul.f32 0.0, %v2062_v7 }
  0xb8   : > { %842 = vrot.lane.b32.xlu0 %v817_v5, %s1750_s20 }
  0xb9   : > { %v2069_v11 = vpop.permute.xlu1 %1095  ;;  %v2071_v12 = vpop.permute.xlu0 %1015 }
  0xba   : > { %v1026_v13 = vmul.f32 0.0, %v2071_v12  ;;  %v1106_v15 = vmul.f32 0.0, %v2069_v11 }
  0xbc   : > { %916 = vrot.lane.b32.xlu0 %v898_v10, %s1751_s24  ;;  %1052 = vrot.lane.b32.xlu1 %v1026_v13, %s1752_s17 }
  0xbd   : > { %v2076_v14 = vpop.permute.xlu1 %1010  ;;  %v2079_v16 = vpop.permute.xlu0 %1005 }
  0xbe   : > { %v1020_v19 = vmul.f32 0.0, %v2079_v16  ;;  %v1023_v23 = vmul.f32 0.0, %v2076_v14 }
  0xc0   : > { %1132 = vrot.lane.b32.xlu0 %v1106_v15, %s1753_s21  ;;  %922 = vrot.lane.b32.xlu1 %v901_v17, %s1751_s24 }
  0xc1   : > { %v2084_v18 = vpop.permute.xlu1 %1085  ;;  %v2087_v20 = vpop.permute.xlu0 %1175 }
  0xc2   : > { %v1186_v21 = vmul.f32 0.0, %v2087_v20  ;;  %v1100_v26 = vmul.f32 0.0, %v2084_v18 }
  0xc4   : > { %1040 = vrot.lane.b32.xlu0 %v1020_v19, %s1752_s17  ;;  %1212 = vrot.lane.b32.xlu1 %v1186_v21, %s1754_s0 }
  0xc5   : > { %v2092_v22 = vpop.permute.xlu1 %1249  ;;  %v2097_v25 = vpop.permute.xlu0 %1090 }
  0xc6   : > { %v1260_v24 = vmul.f32 0.0, %v2092_v22  ;;  %v1103_v27 = vmul.f32 0.0, %v2097_v25 }
  0xc8   : > { %1046 = vrot.lane.b32.xlu0 %v1023_v23, %s1752_s17  ;;  %1286 = vrot.lane.b32.xlu1 %v1260_v24, %s1755_s22 }
  0xc9   : > { %v2103_v28 = vpop.permute.xlu0 %1165  ;;  %v2107_v30 = vpop.permute.xlu1 %1170 }
  0xca   : > { %v1180_v29 = vmul.f32 0.0, %v2103_v28  ;;  %v1183_v31 = vmul.f32 0.0, %v2107_v30 }
  0xcc   : > { %1120 = vrot.lane.b32.xlu0 %v1100_v26, %s1753_s21 }
  0xcd   : > { %v2128_v0 = vpop.permute.xlu0 %1239  ;;  %v2142_v23 = vpop.permute.xlu1 %1244 }
  0xd0   : > { %1126 = vrot.lane.b32.xlu0 %v1103_v27, %s1753_s21 }
  0xd1   : > { %v976_v27 = vpop.permute.xlu0 %975 }
  0xd4   : > { %1200 = vrot.lane.b32.xlu0 %v1180_v29, %s1754_s0 }
  0xd8   : > { %1206 = vrot.lane.b32.xlu0 %v1183_v31, %s1754_s0 }
  0xe3   : > { %v509_v32 = vpop.f32.mrf.mxu0 }
  0xe4   : > { %v544_v33 = vmul.f32 %v2012_v43, %v509_v32 }
  0xe5   : > { %v511_v34 = vpop.f32.mrf.mxu0 }
  0xe6   : > { %v568_v35 = vadd.f32 %v2022_v48, %v544_v33  ;;  %v545_v36 = vmul.f32 %v2012_v43, %v511_v34 }
  0xe7   : > { %v513_v37 = vpop.f32.mrf.mxu0 }
  0xe8   : > { %v574_v38 = vmax.f32 %v568_v35, 0.0  ;;  %v569_v39 = vadd.f32 %v2022_v48, %v545_v36  ;;  %v546_v52 = vmul.f32 %v2016_v45, %v513_v37  ;;  %v971_v36 = vpop.permute.xlu0 %970 }
  0xe9   : > { %v515_v40 = vpop.f32.mrf.mxu0 }
  0xea   : > { %v2116_v41 = vmin.f32 %v574_v38, 6.0  ;;  %v575_v51 = vmax.f32 %v569_v39, 0.0  ;;  %v547_v55 = vmul.f32 %v2016_v45, %v515_v40  ;;  %v570_v45 = vadd.f32 %v2020_v47, %v546_v52 }
  0xeb   : > { %v519_v42 = vpop.f32.mrf.mxu0 }
  0xec   : > { %v548_v57 = vmul.f32 %v2014_v44, %v519_v42  ;;  %v741_v60 = vmul.f32 %v2049_v62, %v2116_v41  ;;  %v657_v43 = vmul.f32 %v2031_v53, %v2116_v41  ;;  %v2130_v4 = vmin.f32 %v575_v51, 6.0 }
  0xed   : > { %v521_v59 = vpop.f32.mrf.mxu0  ;;  %v571_v5 = vadd.f32 %v2020_v47, %v547_v55  ;;  %v1098_v15 = vmul.f32 %v2084_v18, %v2116_v41  ;;  %v576_v19 = vmax.f32 %v570_v45, 0.0  ;;  %v1018_v31 = vmul.f32 %v2079_v16, %v2116_v41 }
  0xee   : > { %v549_v48 = vmul.f32 %v2014_v44, %v521_v59  ;;  %760 = vrot.lane.b32.xlu1 %v741_v60, %s1748_s15  ;;  %680 = vrot.lane.b32.xlu0 %v657_v43, %s1749_s16  ;;  %v572_v10 = vadd.f32 %v2018_v46, %v548_v57  ;;  %v815_v44 = vmul.f32 %v2057_v3, %v2116_v41  ;;  %v2194_v57 = vpop.permute.xlu0 %1328 }
  0xef   : > { %v523_v63 = vpop.f32.mrf.mxu0  ;;  %v577_v21 = vmax.f32 %v571_v5, 0.0  ;;  %v742_v26 = vmul.f32 %v2049_v62, %v2130_v4  ;;  %v2150_v29 = vmin.f32 %v576_v19, 6.0  ;;  %v816_v35 = vmul.f32 %v2057_v3, %v2130_v4  ;;  %v966_v62 = vpop.permute.xlu1 %965 }
  0xf0   : > { %v573_v13 = vadd.f32 %v2018_v46, %v549_v48  ;;  %v578_v47 = vmax.f32 %v572_v10, 0.0  ;;  %v899_v46 = vmul.f32 %v2065_v8, %v2116_v41  ;;  %v1178_v37 = vmul.f32 %v2103_v28, %v2116_v41 }
  0xf1   : > { %v524_v17 = vpop.f32.mrf.mxu0  ;;  %v2154_v32 = vmin.f32 %v577_v21, 6.0  ;;  %v900_v38 = vmul.f32 %v2065_v8, %v2130_v4  ;;  %v2169_v39 = vmul.f32 %v966_v62, %v2116_v41  ;;  %v2172_v40 = vmul.f32 %v966_v62, %v2130_v4 }
  0xf2   : > { %838 = vrot.lane.b32.xlu1 %v815_v44, %s1750_s20  ;;  %1116 = vrot.lane.b32.xlu0 %v1098_v15, %s1753_s21  ;;  %v579_v24 = vmax.f32 %v573_v13, 0.0  ;;  %v2156_v33 = vmin.f32 %v578_v47, 6.0  ;;  %v2175_v3 = vmul.f32 %v971_v36, %v2150_v29  ;;  %v658_v8 = vmul.f32 %v2031_v53, %v2130_v4  ;;  %v2206_v48 = vpop.permute.xlu0 %1352 }
  0xf3   : > { %v2178_v42 = vmul.f32 %v971_v36, %v2154_v32  ;;  %v660_v55 = vmul.f32 %v2041_v58, %v2150_v29  ;;  %v1019_v59 = vmul.f32 %v2079_v16, %v2130_v4  ;;  %v1021_v60 = vmul.f32 %v2076_v14, %v2150_v29 }
  0xf4   : > { %v2158_v34 = vmin.f32 %v579_v24, 6.0  ;;  %v2181_v51 = vmul.f32 %v976_v27, %v2156_v33  ;;  %v1099_v53 = vmul.f32 %v2084_v18, %v2130_v4  ;;  %v1181_v43 = vmul.f32 %v2107_v30, %v2150_v29 }
  0xf5   : > { %v1179_v16 = vmul.f32 %v2103_v28, %v2130_v4  ;;  %v745_v63 = vmul.f32 %v2046_v61, %v2154_v32  ;;  %v744_v45 = vmul.f32 %v2046_v61, %v2150_v29  ;;  %v819_v5 = vmul.f32 %v2054_v1, %v2154_v32 }
  0xf6   : > { %918 = vrot.lane.b32.xlu1 %v899_v46, %s1751_s24  ;;  %762 = vrot.lane.b32.xlu0 %v742_v26, %s1748_s15  ;;  %v2184_v52 = vmul.f32 %v976_v27, %v2158_v34  ;;  %v2216_v18 = vpop.permute.xlu0 %1323  ;;  %v818_v28 = vmul.f32 %v2054_v1, %v2150_v29  ;;  %v903_v10 = vmul.f32 %v2062_v7, %v2154_v32  ;;  %v2263_v26 = vpop.permute.xlu1 %1318 }
  0xf7   : > { %v902_v61 = vmul.f32 %v2062_v7, %v2150_v29  ;;  %v747_v44 = vmul.f32 %v2024_v49, %v2156_v33  ;;  %v1101_v15 = vmul.f32 %v2097_v25, %v2150_v29  ;;  %v821_v17 = vmul.f32 %v2034_v54, %v2156_v33 }
  0xf8   : > { %v661_v19 = vmul.f32 %v2041_v58, %v2154_v32  ;;  %v1104_v21 = vmul.f32 %v2069_v11, %v2156_v33  ;;  %v1022_v47 = vmul.f32 %v2076_v14, %v2154_v32  ;;  %v664_v24 = vmul.f32 %v2026_v50, %v2158_v34 }
  0xf9   : > { %v1254_v58 = vmul.f32 0.0, %v2128_v0  ;;  %v1102_v27 = vmul.f32 %v2097_v25, %v2154_v32  ;;  %v906_v62 = vmul.f32 %v2037_v56, %v2158_v34  ;;  %v663_v25 = vmul.f32 %v2026_v50, %v2156_v33 }
  0xfa   : > { %1036 = vrot.lane.b32.xlu1 %v1018_v31, %s1752_s17  ;;  %840 = vrot.lane.b32.xlu0 %v816_v35, %s1750_s20  ;;  %v1182_v35 = vmul.f32 %v2107_v30, %v2154_v32  ;;  %v1025_v36 = vmul.f32 %v2071_v12, %v2158_v34  ;;  %v1257_v30 = vmul.f32 0.0, %v2142_v23 }
  0xfe   : > { %1196 = vrot.lane.b32.xlu1 %v1178_v37, %s1754_s0  ;;  %920 = vrot.lane.b32.xlu0 %v900_v38, %s1751_s24 }
 0x102   : > { %682 = vrot.lane.b32.xlu1 %v658_v8, %s1749_s16  ;;  %686 = vrot.lane.b32.xlu0 %v660_v55, %s1749_s16  ;;  %v905_v8 = vmul.f32 %v2037_v56, %v2156_v33  ;;  %v1184_v56 = vmul.f32 %v2087_v20, %v2156_v33 }
 0x106   : > { %1038 = vrot.lane.b32.xlu1 %v1019_v59, %s1752_s17  ;;  %1042 = vrot.lane.b32.xlu0 %v1021_v60, %s1752_s17  ;;  %v1024_v59 = vmul.f32 %v2071_v12, %v2156_v33  ;;  %v1185_v60 = vmul.f32 %v2087_v20, %v2158_v34  ;;  %v1258_v12 = vmul.f32 %v2092_v22, %v2156_v33  ;;  %v1338_v20 = vld [vmem:[%s2608_s6 + $0x8] sm:$0xff] }
 0x10a   : > { %1118 = vrot.lane.b32.xlu1 %v1099_v53, %s1753_s21  ;;  %1202 = vrot.lane.b32.xlu0 %v1181_v43, %s1754_s0  ;;  %v1259_v53 = vmul.f32 %v2092_v22, %v2158_v34  ;;  %v1491_v22 = vld [vmem:[%s2613_s11] sm:$0xff] }
 0x10e   : > { %1198 = vrot.lane.b32.xlu1 %v1179_v16, %s1754_s0  ;;  %768 = vrot.lane.b32.xlu0 %v745_v63, %s1748_s15  ;;  %v1255_v63 = vmul.f32 %v2142_v23, %v2150_v29  ;;  %v822_v29 = vmul.f32 %v2034_v54, %v2158_v34 }
 0x112   : > { %766 = vrot.lane.b32.xlu1 %v744_v45, %s1748_s15  ;;  %846 = vrot.lane.b32.xlu0 %v819_v5, %s1750_s20 }
 0x116   : > { %v2228_v13 = vpop.permute.xlu0 %690  ;;  %844 = vrot.lane.b32.xlu1 %v818_v28, %s1750_s20  ;;  %926 = vrot.lane.b32.xlu0 %v903_v10, %s1751_s24  ;;  %v2269_v14 = vpop.permute.xlu1 %770  ;;  %v748_v28 = vmul.f32 %v2024_v49, %v2158_v34  ;;  %v1499_v49 = vld [vmem:[%s2614_s12] sm:$0xff] }
 0x11a   : > { %924 = vrot.lane.b32.xlu1 %v902_v61, %s1751_s24  ;;  %772 = vrot.lane.b32.xlu0 %v747_v44, %s1748_s15  ;;  %v2283_v37 = vpop.permute.xlu1 %848  ;;  %v1253_v61 = vmul.f32 %v2128_v0, %v2130_v4 }
 0x11e   : > { %v2238_v1 = vpop.permute.xlu0 %928  ;;  %1122 = vrot.lane.b32.xlu1 %v1101_v15, %s1753_s21  ;;  %850 = vrot.lane.b32.xlu0 %v821_v17, %s1750_s20  ;;  %v679_v50 = vpop.permute.xlu1 %678  ;;  %v1105_v15 = vmul.f32 %v2069_v11, %v2158_v34  ;;  %v598_v17 = vlaneseq  ;;  %v1337_v11 = vld [vmem:[%s2608_s6] sm:$0xff] }
 0x120   : > { %v599_v4 = vand.u32 127, %v598_v17 }
 0x122   : > { %v2246_v7 = vpop.permute.xlu0 %684  ;;  %688 = vrot.lane.b32.xlu1 %v661_v19, %s1749_s16  ;;  %1128 = vrot.lane.b32.xlu0 %v1104_v21, %s1753_s21  ;;  %v759_v43 = vpop.permute.xlu1 %758  ;;  %v1256_v19 = vmul.f32 %v2142_v23, %v2154_v32  ;;  %v605_v34 = vand.u32 15, %v599_v4 }
 0x124   : > { %vm2364_vm4 = vcmp.gt.s32.totalorder %v605_v34, 0  ;;  %vm2375_vm6 = vcmp.lt.s32.totalorder %v605_v34, 15 }
 0x126   : > { %v2258_v46 = vpop.permute.xlu0 %764  ;;  %1044 = vrot.lane.b32.xlu1 %v1022_v47, %s1752_s17  ;;  %694 = vrot.lane.b32.xlu0 %v664_v24, %s1749_s16  ;;  %v837_v45 = vpop.permute.xlu1 %836  ;;  %v1252_v24 = vmul.f32 %v2128_v0, %v2116_v41  ;;  %v1430_v41 = vld [vmem:[%s2610_s8] sm:$0xff] }
 0x12a   : > { %1124 = vrot.lane.b32.xlu1 %v1102_v27, %s1753_s21  ;;  %1274 = vrot.lane.b32.xlu0 %v1254_v58, %s1755_s22  ;;  %v2271_v31 = vpop.permute.xlu0 %842 }
 0x12e   : > { %1204 = vrot.lane.b32.xlu1 %v1182_v35, %s1754_s0  ;;  %932 = vrot.lane.b32.xlu0 %v906_v62, %s1751_s24  ;;  %v2285_v38 = vpop.permute.xlu0 %916  ;;  %v2329_v33 = vpop.permute.xlu1 %1052 }
 0x132   : > { %692 = vrot.lane.b32.xlu1 %v663_v25, %s1749_s16  ;;  %1050 = vrot.lane.b32.xlu0 %v1025_v36, %s1752_s17  ;;  %v2294_v55 = vpop.permute.xlu0 %1132  ;;  %v2340_v44 = vpop.permute.xlu1 %922 }
 0x136   : > { %930 = vrot.lane.b32.xlu1 %v905_v8, %s1751_s24  ;;  %1280 = vrot.lane.b32.xlu0 %v1257_v30, %s1755_s22  ;;  %v2306_v16 = vpop.permute.xlu0 %1040  ;;  %v2349_v21 = vpop.permute.xlu1 %1212  ;;  %v1438_v8 = vld [vmem:[%s2611_s9] sm:$0xff] }
 0x13a   : > { %1048 = vrot.lane.b32.xlu1 %v1024_v59, %s1752_s17  ;;  %1210 = vrot.lane.b32.xlu0 %v1185_v60, %s1754_s0  ;;  %v2319_v5 = vpop.permute.xlu0 %1046  ;;  %v2360_v58 = vpop.permute.xlu1 %1286 }
 0x13e   : > { %1208 = vrot.lane.b32.xlu1 %v1184_v56, %s1754_s0  ;;  %1284 = vrot.lane.b32.xlu0 %v1259_v53, %s1755_s22  ;;  %v2331_v10 = vpop.permute.xlu0 %1120 }
 0x142   : > { %1282 = vrot.lane.b32.xlu1 %v1258_v12, %s1755_s22  ;;  %1276 = vrot.lane.b32.xlu0 %v1255_v63, %s1755_s22  ;;  %v2342_v54 = vpop.permute.xlu0 %1126 }
 0x146   : > { %774 = vrot.lane.b32.xlu1 %v748_v28, %s1748_s15  ;;  %1347 = vperm.xlu0 %1681, %v1338_v20   ;;  %v2351_v47 = vpop.permute.xlu0 %1200  ;;  %s431_s15 = sand.u32 1, %s1737_s26  }
 0x147   : > { %s1512_s17 = scalar_lea.sflag [#allocation4], %s431_s15 }
 0x14a   : > { %852 = vrot.lane.b32.xlu1 %v822_v29, %s1750_s20  ;;  %1494 = vperm.xlu0 %1681, %v1491_v22   ;;  %v2362_v23 = vpop.permute.xlu0 %1206  ;;  %s1589_s20 = sshll.u32 %s431_s15, 4 }
 0x14b   : > { %s433_s23 = scalar_lea.vmem [#allocation3], %s1589_s20 }
 0x14e   : > { %1272 = vrot.lane.b32.xlu1 %v1253_v61, %s1755_s22  ;;  %1502 = vperm.xlu0 %1681, %v1499_v49  }
 0x152   : > { %1130 = vrot.lane.b32.xlu1 %v1105_v15, %s1753_s21  ;;  %s1632_s21 = sshll.u32 %s1848_s29, 8  ;;  %s1756_s29 = smov [#allocation3]  }
 0x153   : > { %s1524_s24 = scalar_lea.hbm %s2615_s13, %s1632_s21  ;;  %s1689_s20 = sshll.u32 %s1756_s29, 4  ;;  %s1690_s20 = int_to_ptr.vmem [resolvable:$false] %s1689_s20 }
 0x154   : > { %s1691_s1 = scalar_lea.vmem %s1690_s20, 512 }
 0x156   : > { %1278 = vrot.lane.b32.xlu1 %v1256_v19, %s1755_s22 }
 0x15a   : > { %1270 = vrot.lane.b32.xlu1 %v1252_v24, %s1755_s22  ;;  %s1526_s22 = sshll.u32 %s433_s23, 4  ;;  %s1527_s22 = int_to_ptr.vmem [resolvable:$true] %s1526_s22 }
 0x15b   : > { %s1685_s0 = scalar_lea.vmem %s1527_s22, 256  ;;  %p1692_p0 = scmp.lt.s32.totalorder %s1527_s22, %s1690_s20 }
 0x15c   : > { %p1686_p11 = scmp.ne.s32.totalorder %s1527_s22, %s1685_s0  ;;  %p1693_p1 = scmp.lt.s32.totalorder %s1691_s1, %s1685_s0 }
 0x15e   : > { %1342 = vperm.xlu1 %1682, %v1337_v11   ;;  %p1687_p12 = pnand %p1686_p11, %p1865_p5  ;;  %p1694_p2 = por %p1693_p1, %p1692_p0 }
 0x160   : > { %v761_v0 = vpop.permute.xlu1 %760  ;;  %v681_v27 = vpop.permute.xlu0 %680  ;;  %p1688_p13 = pneg %p1687_p12 }
 0x161   : > { %v777_v35 = vsel %vm776_vm2, %v759_v43, %v761_v0  ;;  %v697_v62 = vsel %vm696_vm3, %v679_v50, %v681_v27 }
 0x162   : > { %v709_v25 = vsel %vm2364_vm4, %v697_v62, 0.0  ;;  %1433 = vperm.xlu1 %1682, %v1430_v41   ;;  %p1695_p3 = pnand %p1694_p2, %p1688_p13 }
 0x163   : > { %v789_v36 = vadd.f32 %v777_v35, %v709_v25 }
 0x164   : > { %v839_v59 = vpop.permute.xlu1 %838  ;;  %v1117_v60 = vpop.permute.xlu0 %1116 }
 0x165   : > { %v855_v56 = vsel %vm854_vm5, %v837_v45, %v839_v59  ;;  %v600_v45 = vadd.s32 128, %v599_v4 }
 0x166   : > { %v867_v50 = vsel %vm2375_vm6, %v855_v56, 0.0  ;;  %1441 = vperm.xlu1 %1682, %v1438_v8  }
 0x167   : > { %v873_v53 = vadd.f32 %v867_v50, %v789_v36  ;;  %v612_v24 = vand.u32 15, %v600_v45 }
 0x168   : > { %v919_v43 = vpop.permute.xlu1 %918  ;;  %v763_v12 = vpop.permute.xlu0 %762 }
 0x169   : > { %v935_v63 = vsel %vm934_vm7, %v2285_v38, %v919_v43  ;;  %v778_v20 = vsel %vm776_vm2, %v761_v0, %v763_v12  ;;  %vm2393_vm8 = vcmp.lt.s32.totalorder %v612_v24, 15  ;;  %vm2397_vm9 = vcmp.gt.s32.totalorder %v612_v24, 0 }
 0x16a   : > { %v947_v28 = vsel %vm2364_vm4, %v935_v63, 0.0 }
 0x16b   : > { %v953_v22 = vadd.f32 %v947_v28, %v873_v53 }
 0x16c   : > { %v1037_v29 = vpop.permute.xlu1 %1036  ;;  %v841_v49 = vpop.permute.xlu0 %840 }
 0x16d   : > { %v856_v61 = vsel %vm854_vm5, %v839_v59, %v841_v49  ;;  %v984_v15 = vadd.f32 %v2169_v39, %v953_v22 }
 0x16e   : > { %v868_v62 = vsel %vm2393_vm8, %v856_v61, 0.0 }
 0x170   : > { %v1197_v17 = vpop.permute.xlu1 %1196  ;;  %v921_v19 = vpop.permute.xlu0 %920 }
 0x171   : > { %v936_v11 = vsel %vm934_vm7, %v919_v43, %v921_v19 }
 0x172   : > { %v948_v56 = vsel %vm2397_vm9, %v936_v11, 0.0 }
 0x174   : > { %v683_v34 = vpop.permute.xlu1 %682  ;;  %v687_v38 = vpop.permute.xlu0 %686 }
 0x175   : > { %v698_v4 = vsel %vm696_vm3, %v681_v27, %v683_v34 }
 0x176   : > { %v710_v39 = vsel %vm2397_vm9, %v698_v4, 0.0 }
 0x177   : > { %v790_v35 = vadd.f32 %v778_v20, %v710_v39  ;;  %v699_v39 = vsel %vm696_vm3, %v2246_v7, %v687_v38 }
 0x178   : > { %v1039_v25 = vpop.permute.xlu1 %1038  ;;  %v1043_v36 = vpop.permute.xlu0 %1042 }
 0x179   : > { %v874_v8 = vadd.f32 %v868_v62, %v790_v35  ;;  %v1055_v59 = vsel %vm1054_vm10, %v1037_v29, %v1039_v25  ;;  %v1056_v53 = vsel %vm1054_vm10, %v1039_v25, %v2306_v16  ;;  %v711_v62 = vsel %vm2364_vm4, %v699_v39, 0.0 }
 0x17a   : > { %v1067_v50 = vsel %vm2375_vm6, %v1055_v59, 0.0  ;;  %v1068_v29 = vsel %vm2393_vm8, %v1056_v53, 0.0 }
 0x17b   : > { %v954_v27 = vadd.f32 %v948_v56, %v874_v8  ;;  %v1073_v43 = vadd.f32 %v1067_v50, %v984_v15 }
 0x17c   : > { %v1119_v12 = vpop.permute.xlu1 %1118  ;;  %v2413_v63 = vpop.permute.xlu0 %1202 }
 0x17d   : > { %v985_v20 = vadd.f32 %v2172_v40, %v954_v27  ;;  %v1135_v28 = vsel %vm1134_vm11, %v1117_v60, %v1119_v12  ;;  %v1136_v22 = vsel %vm1134_vm11, %v1119_v12, %v2331_v10 }
 0x17e   : > { %v1147_v49 = vsel %vm2364_vm4, %v1135_v28, 0.0  ;;  %v1148_v61 = vsel %vm2397_vm9, %v1136_v22, 0.0 }
 0x17f   : > { %v1074_v45 = vadd.f32 %v1068_v29, %v985_v20  ;;  %v1153_v16 = vadd.f32 %v1147_v49, %v1073_v43 }
 0x180   : > { %v1199_v15 = vpop.permute.xlu1 %1198  ;;  %v769_v19 = vpop.permute.xlu0 %768 }
 0x181   : > { %v1154_v40 = vadd.f32 %v1148_v61, %v1074_v45  ;;  %v1215_v60 = vsel %vm1214_vm12, %v1197_v17, %v1199_v15  ;;  %v1216_v10 = vsel %vm1214_vm12, %v1199_v15, %v2351_v47 }
 0x182   : > { %v2428_v24 = vadd.f32 %v1215_v60, %v1153_v16 }
 0x183   : > { %v2430_v11 = vadd.f32 %v1216_v10, %v1154_v40 }
 0x184   : > { %v767_v34 = vpop.permute.xlu1 %766  ;;  %v847_v4 = vpop.permute.xlu0 %846 }
 0x185   : > { %v779_v35 = vsel %vm776_vm2, %v2258_v46, %v767_v34  ;;  %v780_v29 = vsel %vm776_vm2, %v767_v34, %v769_v19 }
 0x186   : > { %v791_v8 = vadd.f32 %v779_v35, %v711_v62 }
 0x188   : > { %v845_v25 = vpop.permute.xlu1 %844  ;;  %v927_v17 = vpop.permute.xlu0 %926 }
 0x189   : > { %v857_v47 = vsel %vm854_vm5, %v2271_v31, %v845_v25  ;;  %v858_v31 = vsel %vm854_vm5, %v845_v25, %v847_v4 }
 0x18a   : > { %v869_v59 = vsel %vm2375_vm6, %v857_v47, 0.0  ;;  %v870_v16 = vsel %vm2393_vm8, %v858_v31, 0.0 }
 0x18b   : > { %v875_v56 = vadd.f32 %v869_v59, %v791_v8 }
 0x18c   : > { %v925_v50 = vpop.permute.xlu1 %924  ;;  %v773_v27 = vpop.permute.xlu0 %772 }
 0x18d   : > { %v937_v7 = vsel %vm934_vm7, %v2340_v44, %v925_v50  ;;  %v938_v44 = vsel %vm934_vm7, %v925_v50, %v927_v17 }
 0x18e   : > { %v949_v46 = vsel %vm2364_vm4, %v937_v7, 0.0 }
 0x18f   : > { %v955_v53 = vadd.f32 %v949_v46, %v875_v56 }
 0x190   : > { %v1123_v43 = vpop.permute.xlu1 %1122  ;;  %v851_v20 = vpop.permute.xlu0 %850 }
 0x191   : > { %v986_v12 = vadd.f32 %v2175_v3, %v955_v53  ;;  %v781_v53 = vsel %vm776_vm2, %v2269_v14, %v773_v27 }
 0x194   : > { %v689_v28 = vpop.permute.xlu1 %688  ;;  %v2455_v61 = vpop.permute.xlu0 %1128 }
 0x195   : > { %v700_v22 = vsel %vm696_vm3, %v687_v38, %v689_v28  ;;  %v950_v38 = vsel %vm2397_vm9, %v938_v44, 0.0 }
 0x196   : > { %v712_v49 = vsel %vm2397_vm9, %v700_v22, 0.0 }
 0x197   : > { %v792_v45 = vadd.f32 %v780_v29, %v712_v49 }
 0x198   : > { %v1045_v3 = vpop.permute.xlu1 %1044  ;;  %v695_v35 = vpop.permute.xlu0 %694 }
 0x199   : > { %v876_v15 = vadd.f32 %v870_v16, %v792_v45  ;;  %v1057_v40 = vsel %vm1054_vm10, %v1043_v36, %v1045_v3 }
 0x19a   : > { %v1069_v19 = vsel %vm2375_vm6, %v1057_v40, 0.0 }
 0x19b   : > { %v956_v60 = vadd.f32 %v950_v38, %v876_v15  ;;  %v1075_v4 = vadd.f32 %v1069_v19, %v986_v12  ;;  %v859_v12 = vsel %vm854_vm5, %v2283_v37, %v851_v20  ;;  %v1058_v37 = vsel %vm1054_vm10, %v1045_v3, %v2319_v5 }
 0x19c   : > { %v1125_v10 = vpop.permute.xlu1 %1124  ;;  %v2468_v17 = vpop.permute.xlu0 %1274  ;;  %v1070_v5 = vsel %vm2393_vm8, %v1058_v37, 0.0 }
 0x19d   : > { %v987_v34 = vadd.f32 %v2178_v42, %v956_v60  ;;  %v1137_v39 = vsel %vm1134_vm11, %v1123_v43, %v1125_v10 }
 0x19e   : > { %v1149_v62 = vsel %vm2364_vm4, %v1137_v39, 0.0 }
 0x19f   : > { %v2466_v25 = vadd.f32 %v1149_v62, %v1075_v4  ;;  %v1138_v62 = vsel %vm1134_vm11, %v1125_v10, %v2342_v54 }
 0x1a0   : > { %v1205_v36 = vpop.permute.xlu1 %1204  ;;  %v933_v59 = vpop.permute.xlu0 %932 }
 0x1a4   : > { %v693_v8 = vpop.permute.xlu1 %692  ;;  %v1051_v42 = vpop.permute.xlu0 %1050 }
 0x1a5   : > { %v701_v50 = vsel %vm696_vm3, %v2228_v13, %v693_v8  ;;  %v871_v13 = vsel %vm2375_vm6, %v859_v12, 0.0  ;;  %v702_v49 = vsel %vm696_vm3, %v693_v8, %v695_v35  ;;  %v1060_v8 = vsel %vm1054_vm10, %v1051_v42, %v2329_v33 }
 0x1a6   : > { %v713_v46 = vsel %vm2364_vm4, %v701_v50, 0.0  ;;  %v714_v16 = vsel %vm2397_vm9, %v702_v49, 0.0  ;;  %v1072_v12 = vsel %vm2393_vm8, %v1060_v8, 0.0 }
 0x1a7   : > { %v793_v28 = vadd.f32 %v781_v53, %v713_v46  ;;  %v1150_v53 = vsel %vm2397_vm9, %v1138_v62, 0.0 }
 0x1a8   : > { %v931_v47 = vpop.permute.xlu1 %930  ;;  %v1281_v31 = vpop.permute.xlu0 %1280 }
 0x1a9   : > { %v939_v22 = vsel %vm934_vm7, %v2238_v1, %v931_v47  ;;  %v877_v44 = vadd.f32 %v871_v13, %v793_v28  ;;  %v940_v40 = vsel %vm934_vm7, %v931_v47, %v933_v59  ;;  %v1076_v59 = vadd.f32 %v1070_v5, %v987_v34 }
 0x1aa   : > { %v951_v45 = vsel %vm2364_vm4, %v939_v22, 0.0  ;;  %v952_v3 = vsel %vm2397_vm9, %v940_v40, 0.0 }
 0x1ab   : > { %v957_v38 = vadd.f32 %v951_v45, %v877_v44 }
 0x1ac   : > { %v1049_v56 = vpop.permute.xlu1 %1048  ;;  %v1211_v15 = vpop.permute.xlu0 %1210 }
 0x1ad   : > { %v1059_v39 = vsel %vm1054_vm10, %v1049_v56, %v1051_v42  ;;  %v1156_v42 = vadd.f32 %v1150_v53, %v1076_v59  ;;  %v1220_v32 = vsel %vm1214_vm12, %v1211_v15, %v2349_v21 }
 0x1ae   : > { %v1071_v56 = vsel %vm2375_vm6, %v1059_v39, 0.0 }
 0x1b0   : > { %v1209_v7 = vpop.permute.xlu1 %1208  ;;  %v1285_v50 = vpop.permute.xlu0 %1284 }
 0x1b1   : > { %v1294_v22 = vsel %vm1288_vm13, %v1285_v50, %v2360_v58  ;;  %v1219_v44 = vsel %vm1214_vm12, %v1209_v7, %v1211_v15 }
 0x1b4   : > { %v1283_v43 = vpop.permute.xlu1 %1282  ;;  %v1277_v0 = vpop.permute.xlu0 %1276 }
 0x1b5   : > { %v1293_v13 = vsel %vm1288_vm13, %v1283_v43, %v1285_v50 }
 0x1b8   : > { %v775_v29 = vpop.permute.xlu1 %774 }
 0x1b9   : > { %v782_v14 = vsel %vm776_vm2, %v773_v27, %v775_v29 }
 0x1ba   : > { %v794_v19 = vadd.f32 %v782_v14, %v714_v16  ;;  %v1306_v16 = vsel %vm2393_vm8, %v1294_v22, 0.0 }
 0x1bc   : > { %v853_v1 = vpop.permute.xlu1 %852 }
 0x1bd   : > { %v860_v60 = vsel %vm854_vm5, %v851_v20, %v853_v1  ;;  %v988_v20 = vadd.f32 %v2181_v51, %v957_v38 }
 0x1be   : > { %v872_v4 = vsel %vm2393_vm8, %v860_v60, 0.0 }
 0x1bf   : > { %v878_v27 = vadd.f32 %v872_v4, %v794_v19  ;;  %v1077_v10 = vadd.f32 %v1071_v56, %v988_v20 }
 0x1c0   : > { %v1273_v35 = vpop.permute.xlu1 %1272 }
 0x1c1   : > { %v958_v47 = vadd.f32 %v952_v3, %v878_v27 }
 0x1c3   : > { %v989_v46 = vadd.f32 %v2184_v52, %v958_v47 }
 0x1c4   : > { %v1131_v54 = vpop.permute.xlu1 %1130 }
 0x1c5   : > { %v1078_v33 = vadd.f32 %v1072_v12, %v989_v46  ;;  %v1139_v51 = vsel %vm1134_vm11, %v2455_v61, %v1131_v54  ;;  %v1140_v34 = vsel %vm1134_vm11, %v1131_v54, %v2294_v55  ;;  %v1217_v61 = vsel %vm1214_vm12, %v2413_v63, %v1205_v36 }
 0x1c6   : > { %v1151_v52 = vsel %vm2364_vm4, %v1139_v51, 0.0  ;;  %v1152_v28 = vsel %vm2397_vm9, %v1140_v34, 0.0  ;;  %v1218_v55 = vsel %vm1214_vm12, %v1205_v36, %v2362_v23  ;;  %v1305_v63 = vsel %vm2375_vm6, %v1293_v13, 0.0 }
 0x1c7   : > { %v1157_v29 = vadd.f32 %v1151_v52, %v1077_v10  ;;  %v1158_v49 = vadd.f32 %v1152_v28, %v1078_v33  ;;  %v1229_v15 = vadd.f32 %v1217_v61, %v2466_v25  ;;  %v1230_v1 = vadd.f32 %v1218_v55, %v1156_v42 }
 0x1c8   : > { %v1279_v45 = vpop.permute.xlu1 %1278 }
 0x1c9   : > { %v1231_v14 = vadd.f32 %v1219_v44, %v1157_v29  ;;  %v1232_v37 = vadd.f32 %v1220_v32, %v1158_v49  ;;  %v1291_v58 = vsel %vm1288_vm13, %v1277_v0, %v1279_v45  ;;  %v1292_v43 = vsel %vm1288_vm13, %v1279_v45, %v1281_v31  ;;  %v1446_v29 = vld [vmem:[%s2612_s10] sm:$0xf] }
 0x1ca   : > { %v1303_v21 = vsel %vm2375_vm6, %v1291_v58, 0.0  ;;  %v1304_v36 = vsel %vm2393_vm8, %v1292_v43, 0.0  ;;  %v1290_v31 = vsel %vm1288_vm13, %v1273_v35, %v2468_v17 }
 0x1cb   : > { %v1311_v23 = vadd.f32 %v1305_v63, %v1231_v14  ;;  %v1312_v7 = vadd.f32 %v1306_v16, %v1232_v37  ;;  %v1309_v19 = vadd.f32 %v1303_v21, %v1229_v15  ;;  %v1310_v60 = vadd.f32 %v1304_v36, %v1230_v1 }
 0x1cc   : > { %v1271_v40 = vpop.permute.xlu1 %1270  ;;  %v1302_v25 = vsel %vm2393_vm8, %v1290_v31, 0.0 }
 0x1cd   : > { %v1336_v38 = vmul.f32 %v2194_v57, %v1312_v7  ;;  %v1289_v4 = vsel %vm1288_vm13, %v1271_v40, %v1273_v35  ;;  %v1335_v39 = vmul.f32 %v2194_v57, %v1311_v23  ;;  %v1333_v17 = vmul.f32 %v2216_v18, %v1309_v19 }
 0x1ce   : > { %v1301_v3 = vsel %vm2375_vm6, %v1289_v4, 0.0  ;;  %v1334_v8 = vmul.f32 %v2216_v18, %v1310_v60  ;;  %v1308_v35 = vadd.f32 %v1302_v25, %v2430_v11 }
 0x1cf   : > { %v1360_v27 = vadd.f32 %v2206_v48, %v1336_v38  ;;  %v1359_v5 = vadd.f32 %v2206_v48, %v1335_v39  ;;  %v1307_v57 = vadd.f32 %v1301_v3, %v2428_v24  ;;  %v1348_v48 = vpop.permute.xlu0 %1347 }
 0x1d0   : > { %v1358_v50 = vadd.f32 %v1348_v48, %v1334_v8  ;;  %v1357_v46 = vadd.f32 %v1348_v48, %v1333_v17  ;;  %v1332_v12 = vmul.f32 %v2263_v26, %v1308_v35 }
 0x1d1   : > { %v1366_v62 = vmax.f32 %v1360_v27, 0.0  ;;  %v1365_v20 = vmax.f32 %v1359_v5, 0.0  ;;  %v1331_v53 = vmul.f32 %v2263_v26, %v1307_v57  ;;  %v1373_v26 = vld [vmem:[%s2609_s7] sm:$0xf] }
 0x1d2   : > { %v1364_v11 = vmax.f32 %v1358_v50, 0.0  ;;  %v1363_v33 = vmax.f32 %v1357_v46, 0.0 }
 0x1d3   : > { %v1372_v47 = vmin.f32 %v1366_v62, 6.0  ;;  %v1371_v59 = vmin.f32 %v1365_v20, 6.0  ;;  %v1495_v55 = vpop.permute.xlu0 %1494 }
 0x1d4   : > { %v1370_v52 = vmin.f32 %v1364_v11, 6.0  ;;  %v1369_v28 = vmin.f32 %v1363_v33, 6.0 }
 0x1d5   : > { %v1377_v56 = vpack.c.bf16 %v1372_v47, %v1372_v47  ;;  %v1376_v41 = vpack.c.bf16 %v1371_v59, %v1371_v59 }
 0x1d7   : > { %1622 = vmatprep.subr.msk.bf16.mxu1 %vm1382_vm14, %v1377_v56  ;;  %v1384_v30 = vsel %vm1382_vm14, %v1376_v41, 0 }
 0x1d8   : > { %1402 = vmatpush1.bf16.msra.mxu1 %v1384_v30 }
 0x1d9   : > { %v1343_v18 = vpop.permute.xlu1 %1342 }
 0x1da   : > { %v1355_v54 = vadd.f32 %v1343_v18, %v1331_v53  ;;  %v1356_v10 = vadd.f32 %v1343_v18, %v1332_v12 }
 0x1dc   : > { %v1361_v24 = vmax.f32 %v1355_v54, 0.0  ;;  %v1362_v51 = vmax.f32 %v1356_v10, 0.0 }
 0x1dd   : > { %v1434_v32 = vpop.permute.xlu1 %1433 }
 0x1de   : > { %v1367_v34 = vmin.f32 %v1361_v24, 6.0  ;;  %v1368_v42 = vmin.f32 %v1362_v51, 6.0 }
 0x1e0   : > { %v1375_v22 = vpack.c.bf16 %v1370_v52, %v1368_v42  ;;  %v1374_v13 = vpack.c.bf16 %v1369_v28, %v1367_v34 }
 0x1e1   : > { %v1442_v37 = vpop.permute.xlu1 %1441 }
 0x1e2   : > { %1403 = vmatprep.subr.bf16.mxu1 %v1375_v22 }
 0x1e3   : > { %1404 = vmatpush1.bf16.msra.mxu1 %v1374_v13 }
 0x1e4   : > { %1624 = vmatprep.subr.msk.bf16.mxu1 %vm468_vm0, %v1896_v6 }
 0x1e6   : > { %1623 = vmatmul.mubr.msk.bf16.vlgmr.msra.gmra.mxu1 %vm1378_vm15, %v1373_v26 }
 0x1e7   : > { %1465 = vmatpush1.bf16.msra.mxu1 %v1905_v9  ;;  %1482 = vmatprep.mubr.bf16.mxu1 %v1747_v2  ;;  %v1503_v9 = vpop.permute.xlu0 %1502 }
 0x1ee   : > { %1625 = vmatmul.mubr.msk.bf16.vlgmr.msra.gmra.mxu1 %vm461_vm1, %v1446_v29 }
 0x2a6   : > { %v1423_v49 = vpop.f32.mrf.mxu1 }
 0x2a7   : > { %v1436_v6 = vmul.f32 %v1434_v32, %v1423_v49 }
 0x2a8   : > { %v1425_v61 = vpop.f32.mrf.mxu1 }
 0x2a9   : > { %v1437_v14 = vmul.f32 %v1434_v32, %v1425_v61  ;;  %v1444_v43 = vadd.f32 %v1442_v37, %v1436_v6 }
 0x2aa   : > { %v1427_v44 = vpop.f32.mrf.mxu1 }
 0x2ab   : > { %v1445_v21 = vadd.f32 %v1442_v37, %v1437_v14 }
 0x2ac   : > { %v1428_v0 = vpop.f32.mrf.mxu1 }
 0x2ae   : > { %v1484_v45 = vpop.f32.mrf.mxu1 }
 0x2af   : > { %v1497_v2 = vmul.f32 %v1495_v55, %v1484_v45 }
 0x2b0   : > { %v1486_v58 = vpop.f32.mrf.mxu1 }
 0x2b1   : > { %v1505_v16 = vadd.f32 %v1503_v9, %v1497_v2  ;;  %v1498_v63 = vmul.f32 %v1495_v55, %v1486_v58 }
 0x2b2   : > { %v1488_v23 = vpop.f32.mrf.mxu1 }
 0x2b3   : > { %v1507_v36 = vadd.f32 %v1505_v16, %v1444_v43  ;;  %v1506_v7 = vadd.f32 %v1503_v9, %v1498_v63 }
 0x2b4   : > { %v1489_v15 = vpop.f32.mrf.mxu1 }
 0x2b5   : > { %v1508_v1 = vadd.f32 %v1506_v7, %v1445_v21  ;;  %1509 = vst [vmem:[%s433_s23] sm:$0xff] %v1507_v36 }
 0x2b7   : > { %1510 = vst [vmem:[%s433_s23 + $0x8] sm:$0xff] %v1508_v1 }
 0x2b8   : > { %1698 = shalt.err (!%p1695_p3)
}
 0x2b9   : > { %s1699_s2 = scalar_lea.hbm %s1524_s24, 256  ;;  %s1703_s23 = scalar_lea.hbm %s2615_s13, 512 }
 0x2ba   : > { %p1700_p4 = scmp.ne.s32.totalorder %s1524_s24, %s1699_s2  ;;  %p1704_p9 = scmp.lt.s32.totalorder %s1524_s24, %s2615_s13 }
 0x2bb   : > { %p1705_p10 = scmp.lt.s32.totalorder %s1703_s23, %s1699_s2 }
 0x2bc   : > { %p1701_p7 = pnand %p1700_p4, %p1865_p5 }
 0x2bd   : > { %p1706_p11 = por %p1705_p10, %p1704_p9 }
 0x2be   : > { %p1702_p8 = pneg %p1701_p7 }
 0x2c0   : > { %p1707_p12 = pnand %p1706_p11, %p1702_p8 }
 0x2c2   : > { %1710 = shalt.err (!%p1707_p12)
}
 0x2c3   : > { %1633 = dma.vmem_to_hbm [thread:$0]  (%p1865_p5), %s1527_s22, 256, %s1524_s24, %s1512_s17  }
 0x2c4 PF: > { %p1639_p13 = scmp.ge.s32.totalorder %s1745_s28, 2  ;;  %s1538_s1 = sand.u32 1, %s1733_s25  }
 0x2c5   : > { %s1539_s0 = scalar_lea.sflag [#allocation4], %s1538_s1 }
 0x2c6   : > { %p1636_p0 = pnand %p1639_p13, %p1869_p6 }
 0x2c8   : > { %p1637_p1 = pneg %p1636_p0 }
 0x2ca   : > { %1728 = dma.done.wait (%p1637_p1), %s1539_s0, 256  }
 0x2cb   : > { %1730 = vsyncadd (%p1637_p1), %s1539_s0, 4294967040  ;;  %s2633_s2 = sld [smem:[#allocation6_spill]]  ;;  %p23_p2 = scmp.ge.s32.totalorder %s1852_s14, 4  }
 0x2cc   : > { %s2634_s25 = smov %s1737_s26  ;;  %s2635_s26 = smov %s1741_s27 }
 0x2cd   : > { %s2637_s28 = smov %s1852_s14  ;;  %25 = sbr.rel (!%p23_p2) target bundleno = 7 (0x7), region = 115 }
 0x2d1   : > { %s2636_s27 = smov %s2633_s2 }
 0x2d2   :  { %1544 = vsyncpa [#allocation4], 1 }
 0x2d3   :  { %1546 = vsyncpa [#allocation4 + $0x1], 1 }

</bundles_post_ra>
